<compile_context>
chip_gen: v5e
topology: v5e:2x2
jax: 0.10.0
libtpu: 0.0.40
codegen_flags: <defaults>
</compile_context>

<pallas_src>
import jax
import jax.numpy as jnp
import numpy as np
from jax import lax
from jax.experimental import pallas as pl
from jax.experimental.pallas import tpu as pltpu

H = 32   # hidden_size
L = 16   # latent_size
B = 2    # batch
T = 8    # max sequence length


def inference_kernel(x_ref, mask_ref, wih_ref, bih_ref,
                     whhf_ref, bhhf_ref, whhb_ref, bhhb_ref,
                     w1_ref, b1_ref, w2_ref, b2_ref,
                     loc_ref, scale_ref):
    # ---- hoisted loads: weights stay vreg-resident across the unrolled scan ----
    x = x_ref[...]            # (T*B, H)   time-major, row t*B + b
    m_all = mask_ref[...]     # (T*B, H)   mask pre-broadcast along features
    whh_f = whhf_ref[...]     # (H, 3H)
    bhh_f = bhhf_ref[...]     # (1, 3H)
    whh_b = whhb_ref[...]     # (H, 3H)
    bhh_b = bhhb_ref[...]     # (1, 3H)

    # ---- all input-side gates, both directions, in ONE MXU call ----
    # columns [0:3H] = forward [r|z|n] gates, [3H:6H] = backward gates.
    gx_all = jnp.dot(x, wih_ref[...], preferred_element_type=jnp.float32) + bih_ref[...]

    def gru_step(gx, h, whh, bhh, m):
        # PyTorch GRU gate order along the 3H axis: [r, z, n]
        gh = jnp.dot(h, whh, preferred_element_type=jnp.float32) + bhh
        g = gx + gh                                   # r/z need gx+gh; add once
        r = jax.nn.sigmoid(g[:, 0:H])
        z = jax.nn.sigmoid(g[:, H:2 * H])
        n = jnp.tanh(gx[:, 2 * H:3 * H] + r * gh[:, 2 * H:3 * H])
        h_new = (1.0 - z) * n + z * h
        h = h + m * (h_new - h)                       # freeze h past seq length
        return h, h * m                               # (hidden, zero-padded output)

    h_f = jnp.zeros((B, H), jnp.float32)
    h_b = jnp.zeros((B, H), jnp.float32)
    # Running time-max of the zero-masked outputs. -inf init + max over ALL T
    # steps reproduces torch.max over the zero-padded masked output exactly
    # (padded steps contribute 0, same as pad_packed_sequence's padding value).
    max_f = jnp.full((B, H), -jnp.inf, jnp.float32)
    max_b = jnp.full((B, H), -jnp.inf, jnp.float32)

    # ---- fused fwd/bwd recurrence, fully unrolled (T is a static Python int) ----
    for i in range(T):
        tf = i
        tb = T - 1 - i
        gx_f = gx_all[tf * B:(tf + 1) * B, 0:3 * H]
        gx_b = gx_all[tb * B:(tb + 1) * B, 3 * H:6 * H]
        m_f = m_all[tf * B:(tf + 1) * B, :]
        m_b = m_all[tb * B:(tb + 1) * B, :]
        h_f, out_f = gru_step(gx_f, h_f, whh_f, bhh_f, m_f)
        h_b, out_b = gru_step(gx_b, h_b, whh_b, bhh_b, m_b)
        max_f = jnp.maximum(max_f, out_f)
        max_b = jnp.maximum(max_b, out_b)

    # ---- 'max_hid' pooling: [max_t out_fwd, max_t out_bwd, h_fwd, h_bwd] ----
    final = jnp.concatenate([max_f, max_b, h_f, h_b], axis=-1)    # (B, 4H)

    # ---- fused affine heads ----
    # layer 1: [aff_u_hid | aff_s_hid] share the same LHS -> one matmul
    h12 = jnp.maximum(
        jnp.dot(final, w1_ref[...], preferred_element_type=jnp.float32) + b1_ref[...],
        0.0)                                                      # (B, 2H)
    # layer 2: block-diag(aff_u_out, aff_s_out) -> one matmul
    out12 = jnp.dot(h12, w2_ref[...], preferred_element_type=jnp.float32) + b2_ref[...]  # (B, 2L)

    loc_ref[...] = out12[:, 0:L]
    sc = out12[:, L:2 * L]
    # softplus (log1p-free formulation, numerically safe: 1+exp(-|x|) in [1,2])
    scale_ref[...] = jnp.maximum(sc, 0.0) + jnp.log(1.0 + jnp.exp(-jnp.abs(sc)))


_N_IN = 12
_vmem = pl.BlockSpec(memory_space=pltpu.MemorySpace.VMEM)
_inference_call = pl.pallas_call(
    inference_kernel,
    out_shape=(jax.ShapeDtypeStruct((B, L), jnp.float32),
               jax.ShapeDtypeStruct((B, L), jnp.float32)),
    in_specs=[_vmem] * _N_IN,
    out_specs=(_vmem, _vmem),
)


@jax.jit
def inference_model(x, x_mask, x_len, p):
    """x: (B,T,H) float32, x_mask: (B,1,T), x_len: (B,) int32 (encoded in x_mask)."""
    del x_len  # length information is fully encoded in x_mask

    mask = jnp.squeeze(x_mask, axis=1).astype(jnp.float32)                    # (B, T)
    # time-major flatten: row t*B + b
    x_flat = jnp.transpose(x, (1, 0, 2)).reshape(T * B, H).astype(jnp.float32)
    mask_flat = jnp.broadcast_to(
        jnp.transpose(mask, (1, 0)).reshape(T * B, 1), (T * B, H))            # (T*B, H)

    # fused input-gate weights for both directions: (H, 6H), (1, 6H)
    wih_cat = jnp.concatenate([p['w_ih_f'].T, p['w_ih_b'].T], axis=1)
    bih_cat = jnp.concatenate([p['b_ih_f'], p['b_ih_b']])[None]

    # fused head layer 1: (4H, 2H), (1, 2H)
    w1_cat = jnp.concatenate([p['wu1'].T, p['ws1'].T], axis=1)
    b1_cat = jnp.concatenate([p['bu1'], p['bs1']])[None]
    # fused head layer 2 as block-diagonal: (2H, 2L), (1, 2L)
    zHL = jnp.zeros((H, L), jnp.float32)
    w2_blk = jnp.block([[p['wu2'].T, zHL], [zHL, p['ws2'].T]])
    b2_cat = jnp.concatenate([p['bu2'], p['bs2']])[None]

    return _inference_call(x_flat, mask_flat, wih_cat, bih_cat,
                           p['w_hh_f'].T, p['b_hh_f'][None],
                           p['w_hh_b'].T, p['b_hh_b'][None],
                           w1_cat, b1_cat, w2_blk, b2_cat)


# ---------------- pure-JAX reference (same math, no Pallas) ----------------
def _softplus(x):
    return jnp.maximum(x, 0.0) + jnp.log1p(jnp.exp(-jnp.abs(x)))


def ref_forward(x, x_mask, x_len, p):
    del x_len
    mask = jnp.squeeze(x_mask, axis=1).astype(x.dtype)   # (B, T)

    def cell(h, xt, mt, wih, whh, bih, bhh):
        gx = xt @ wih.T + bih
        gh = h @ whh.T + bhh
        r = jax.nn.sigmoid(gx[:, :H] + gh[:, :H])
        z = jax.nn.sigmoid(gx[:, H:2 * H] + gh[:, H:2 * H])
        n = jnp.tanh(gx[:, 2 * H:] + r * gh[:, 2 * H:])
        h_new = (1 - z) * n + z * h
        mt = mt[:, None]
        h = mt * h_new + (1 - mt) * h
        return h, h * mt

    xs = jnp.transpose(x, (1, 0, 2))
    ms = mask.T
    h0 = jnp.zeros((B, H), jnp.float32)

    def scan_f(h, inp):
        xt, mt = inp
        return cell(h, xt, mt, p['w_ih_f'], p['w_hh_f'], p['b_ih_f'], p['b_hh_f'])

    def scan_b(h, inp):
        xt, mt = inp
        return cell(h, xt, mt, p['w_ih_b'], p['w_hh_b'], p['b_ih_b'], p['b_hh_b'])

    hf, outf = lax.scan(scan_f, h0, (xs, ms))
    hb, outb = lax.scan(scan_b, h0, (xs[::-1], ms[::-1]))
    outb = outb[::-1]
    final = jnp.concatenate([outf.max(0), outb.max(0), hf, hb], axis=-1)
    hu = jax.nn.relu(final @ p['wu1'].T + p['bu1'])
    loc = hu @ p['wu2'].T + p['bu2']
    hs = jax.nn.relu(final @ p['ws1'].T + p['bs1'])
    scale = _softplus(hs @ p['ws2'].T + p['bs2'])
    return loc, scale


def init_params(key):
    def u(k, shape):
        return jax.random.uniform(k, shape, jnp.float32, -0.1, 0.1)
    ks = jax.random.split(key, 16)
    return {
        # bidirectional GRU, input=H, hidden=H, gate order [r, z, n]
        'w_ih_f': u(ks[0], (3 * H, H)), 'w_hh_f': u(ks[1], (3 * H, H)),
        'b_ih_f': u(ks[2], (3 * H,)),   'b_hh_f': u(ks[3], (3 * H,)),
        'w_ih_b': u(ks[4], (3 * H, H)), 'w_hh_b': u(ks[5], (3 * H, H)),
        'b_ih_b': u(ks[6], (3 * H,)),   'b_hh_b': u(ks[7], (3 * H,)),
        # aff_u_hid (4H->H), aff_u_out (H->L), aff_s_hid, aff_s_out
        'wu1': u(ks[8], (H, 4 * H)),  'bu1': u(ks[9], (H,)),
        'wu2': u(ks[10], (L, H)),     'bu2': u(ks[11], (L,)),
        'ws1': u(ks[12], (H, 4 * H)), 'bs1': u(ks[13], (H,)),
        'ws2': u(ks[14], (L, H)),     'bs2': u(ks[15], (L,)),
    }
    # TODO(synk): LSTM rnn_type and z_inference_mode='sum' branches are not implemented;
    # this script fixes config = {'rnn_type': 'gru', 'z_inference_mode': 'max_hid'}.


if __name__ == "__main__":
    key = jax.random.PRNGKey(0)
    kp, kx = jax.random.split(key)
    params = init_params(kp)

    x = jax.random.normal(kx, (B, T, H), jnp.float32)
    x_len = jnp.array([T, 5], jnp.int32)
    x_mask = (jnp.arange(T)[None, None, :] < x_len[:, None, None]).astype(jnp.float32)  # (B,1,T)

    loc, scale = jax.block_until_ready(inference_model(x, x_mask, x_len, params))

    loc_ref, scale_ref = ref_forward(x, x_mask, x_len, params)
    np.testing.assert_allclose(np.asarray(loc), np.asarray(loc_ref), rtol=1e-3, atol=1e-3)
    np.testing.assert_allclose(np.asarray(scale), np.asarray(scale_ref), rtol=1e-3, atol=1e-3)
    assert loc.shape == (B, L) and scale.shape == (B, L)

    print("KERNEL_OK")
</pallas_src>

<mosaic_0001>
module attributes {stable_mosaic.version = 11 : i64} {
  func.func @inference_kernel(%arg0: memref<16x32xf32, #tpu.memory_space<vmem>>, %arg1: memref<16x32xf32, #tpu.memory_space<vmem>>, %arg2: memref<32x192xf32, #tpu.memory_space<vmem>>, %arg3: memref<1x192xf32, #tpu.memory_space<vmem>>, %arg4: memref<32x96xf32, #tpu.memory_space<vmem>>, %arg5: memref<1x96xf32, #tpu.memory_space<vmem>>, %arg6: memref<32x96xf32, #tpu.memory_space<vmem>>, %arg7: memref<1x96xf32, #tpu.memory_space<vmem>>, %arg8: memref<128x64xf32, #tpu.memory_space<vmem>>, %arg9: memref<1x64xf32, #tpu.memory_space<vmem>>, %arg10: memref<64x32xf32, #tpu.memory_space<vmem>>, %arg11: memref<1x32xf32, #tpu.memory_space<vmem>>, %arg12: memref<2x16xf32, #tpu.memory_space<vmem>>, %arg13: memref<2x16xf32, #tpu.memory_space<vmem>>) attributes {dimension_semantics = [], scalar_prefetch = 0 : i64, scratch_operands = 0 : i64, tpu.core_type = #tpu.core_type<tc>} {
    %c0 = arith.constant 0 : index
    %c0_0 = arith.constant 0 : index
    %0 = vector.load %arg0[%c0, %c0_0] : memref<16x32xf32, #tpu.memory_space<vmem>>, vector<16x32xf32>
    %c0_1 = arith.constant 0 : index
    %c0_2 = arith.constant 0 : index
    %1 = vector.load %arg1[%c0_1, %c0_2] : memref<16x32xf32, #tpu.memory_space<vmem>>, vector<16x32xf32>
    %c0_3 = arith.constant 0 : index
    %c0_4 = arith.constant 0 : index
    %2 = vector.load %arg4[%c0_3, %c0_4] : memref<32x96xf32, #tpu.memory_space<vmem>>, vector<32x96xf32>
    %c0_5 = arith.constant 0 : index
    %c0_6 = arith.constant 0 : index
    %3 = vector.load %arg5[%c0_5, %c0_6] : memref<1x96xf32, #tpu.memory_space<vmem>>, vector<1x96xf32>
    %c0_7 = arith.constant 0 : index
    %c0_8 = arith.constant 0 : index
    %4 = vector.load %arg6[%c0_7, %c0_8] : memref<32x96xf32, #tpu.memory_space<vmem>>, vector<32x96xf32>
    %c0_9 = arith.constant 0 : index
    %c0_10 = arith.constant 0 : index
    %5 = vector.load %arg7[%c0_9, %c0_10] : memref<1x96xf32, #tpu.memory_space<vmem>>, vector<1x96xf32>
    %c0_11 = arith.constant 0 : index
    %c0_12 = arith.constant 0 : index
    %6 = vector.load %arg2[%c0_11, %c0_12] : memref<32x192xf32, #tpu.memory_space<vmem>>, vector<32x192xf32>
    %cst = arith.constant dense<0.000000e+00> : vector<16x192xf32>
    %7 = tpu.matmul %0, %6, %cst {dimension_numbers = #tpu.dot_dimension_numbers<[1], [0], [0], [1], [0, 0, 1, 1], [], []>} : vector<16x32xf32>, vector<32x192xf32>, vector<16x192xf32> -> vector<16x192xf32>
    %c0_13 = arith.constant 0 : index
    %c0_14 = arith.constant 0 : index
    %8 = vector.load %arg3[%c0_13, %c0_14] : memref<1x192xf32, #tpu.memory_space<vmem>>, vector<1x192xf32>
    %9 = vector.broadcast %8 : vector<1x192xf32> to vector<16x192xf32>
    %10 = arith.addf %7, %9 : vector<16x192xf32>
    %cst_15 = arith.constant 0.000000e+00 : f32
    %11 = vector.broadcast %cst_15 : f32 to vector<2x32xf32>
    %cst_16 = arith.constant 0.000000e+00 : f32
    %12 = vector.broadcast %cst_16 : f32 to vector<2x32xf32>
    %cst_17 = arith.constant 0xFF800000 : f32
    %13 = vector.broadcast %cst_17 : f32 to vector<2x32xf32>
    %cst_18 = arith.constant 0xFF800000 : f32
    %14 = vector.broadcast %cst_18 : f32 to vector<2x32xf32>
    %15 = vector.extract_strided_slice %10 {offsets = [0, 0], sizes = [2, 96], strides = [1, 1]} : vector<16x192xf32> to vector<2x96xf32>
    %16 = vector.extract_strided_slice %10 {offsets = [14, 96], sizes = [2, 96], strides = [1, 1]} : vector<16x192xf32> to vector<2x96xf32>
    %17 = vector.extract_strided_slice %1 {offsets = [0, 0], sizes = [2, 32], strides = [1, 1]} : vector<16x32xf32> to vector<2x32xf32>
    %18 = vector.extract_strided_slice %1 {offsets = [14, 0], sizes = [2, 32], strides = [1, 1]} : vector<16x32xf32> to vector<2x32xf32>
    %cst_19 = arith.constant dense<0.000000e+00> : vector<2x96xf32>
    %19 = tpu.matmul %11, %2, %cst_19 {dimension_numbers = #tpu.dot_dimension_numbers<[1], [0], [0], [1], [0, 0, 1, 1], [], []>} : vector<2x32xf32>, vector<32x96xf32>, vector<2x96xf32> -> vector<2x96xf32>
    %20 = vector.broadcast %3 : vector<1x96xf32> to vector<2x96xf32>
    %21 = arith.addf %19, %20 : vector<2x96xf32>
    %22 = arith.addf %15, %21 : vector<2x96xf32>
    %23 = vector.extract_strided_slice %22 {offsets = [0, 0], sizes = [2, 32], strides = [1, 1]} : vector<2x96xf32> to vector<2x32xf32>
    %24 = arith.negf %23 : vector<2x32xf32>
    %25 = math.exp %24 : vector<2x32xf32>
    %cst_20 = arith.constant 1.000000e+00 : f32
    %26 = vector.broadcast %cst_20 : f32 to vector<2x32xf32>
    %27 = arith.addf %26, %25 : vector<2x32xf32>
    %28 = arith.divf %26, %27 : vector<2x32xf32>
    %29 = vector.extract_strided_slice %22 {offsets = [0, 32], sizes = [2, 32], strides = [1, 1]} : vector<2x96xf32> to vector<2x32xf32>
    %30 = arith.negf %29 : vector<2x32xf32>
    %31 = math.exp %30 : vector<2x32xf32>
    %cst_21 = arith.constant 1.000000e+00 : f32
    %32 = vector.broadcast %cst_21 : f32 to vector<2x32xf32>
    %33 = arith.addf %32, %31 : vector<2x32xf32>
    %34 = arith.divf %32, %33 : vector<2x32xf32>
    %35 = vector.extract_strided_slice %15 {offsets = [0, 64], sizes = [2, 32], strides = [1, 1]} : vector<2x96xf32> to vector<2x32xf32>
    %36 = vector.extract_strided_slice %21 {offsets = [0, 64], sizes = [2, 32], strides = [1, 1]} : vector<2x96xf32> to vector<2x32xf32>
    %37 = arith.mulf %28, %36 : vector<2x32xf32>
    %38 = arith.addf %35, %37 : vector<2x32xf32>
    %39 = math.tanh %38 : vector<2x32xf32>
    %cst_22 = arith.constant 1.000000e+00 : f32
    %40 = vector.broadcast %cst_22 : f32 to vector<2x32xf32>
    %41 = arith.subf %40, %34 : vector<2x32xf32>
    %42 = arith.mulf %41, %39 : vector<2x32xf32>
    %43 = arith.mulf %34, %11 : vector<2x32xf32>
    %44 = arith.addf %42, %43 : vector<2x32xf32>
    %45 = arith.subf %44, %11 : vector<2x32xf32>
    %46 = arith.mulf %17, %45 : vector<2x32xf32>
    %47 = arith.addf %11, %46 : vector<2x32xf32>
    %48 = arith.mulf %47, %17 : vector<2x32xf32>
    %cst_23 = arith.constant dense<0.000000e+00> : vector<2x96xf32>
    %49 = tpu.matmul %12, %4, %cst_23 {dimension_numbers = #tpu.dot_dimension_numbers<[1], [0], [0], [1], [0, 0, 1, 1], [], []>} : vector<2x32xf32>, vector<32x96xf32>, vector<2x96xf32> -> vector<2x96xf32>
    %50 = vector.broadcast %5 : vector<1x96xf32> to vector<2x96xf32>
    %51 = arith.addf %49, %50 : vector<2x96xf32>
    %52 = arith.addf %16, %51 : vector<2x96xf32>
    %53 = vector.extract_strided_slice %52 {offsets = [0, 0], sizes = [2, 32], strides = [1, 1]} : vector<2x96xf32> to vector<2x32xf32>
    %54 = arith.negf %53 : vector<2x32xf32>
    %55 = math.exp %54 : vector<2x32xf32>
    %cst_24 = arith.constant 1.000000e+00 : f32
    %56 = vector.broadcast %cst_24 : f32 to vector<2x32xf32>
    %57 = arith.addf %56, %55 : vector<2x32xf32>
    %58 = arith.divf %56, %57 : vector<2x32xf32>
    %59 = vector.extract_strided_slice %52 {offsets = [0, 32], sizes = [2, 32], strides = [1, 1]} : vector<2x96xf32> to vector<2x32xf32>
    %60 = arith.negf %59 : vector<2x32xf32>
    %61 = math.exp %60 : vector<2x32xf32>
    %cst_25 = arith.constant 1.000000e+00 : f32
    %62 = vector.broadcast %cst_25 : f32 to vector<2x32xf32>
    %63 = arith.addf %62, %61 : vector<2x32xf32>
    %64 = arith.divf %62, %63 : vector<2x32xf32>
    %65 = vector.extract_strided_slice %16 {offsets = [0, 64], sizes = [2, 32], strides = [1, 1]} : vector<2x96xf32> to vector<2x32xf32>
    %66 = vector.extract_strided_slice %51 {offsets = [0, 64], sizes = [2, 32], strides = [1, 1]} : vector<2x96xf32> to vector<2x32xf32>
    %67 = arith.mulf %58, %66 : vector<2x32xf32>
    %68 = arith.addf %65, %67 : vector<2x32xf32>
    %69 = math.tanh %68 : vector<2x32xf32>
    %cst_26 = arith.constant 1.000000e+00 : f32
    %70 = vector.broadcast %cst_26 : f32 to vector<2x32xf32>
    %71 = arith.subf %70, %64 : vector<2x32xf32>
    %72 = arith.mulf %71, %69 : vector<2x32xf32>
    %73 = arith.mulf %64, %12 : vector<2x32xf32>
    %74 = arith.addf %72, %73 : vector<2x32xf32>
    %75 = arith.subf %74, %12 : vector<2x32xf32>
    %76 = arith.mulf %18, %75 : vector<2x32xf32>
    %77 = arith.addf %12, %76 : vector<2x32xf32>
    %78 = arith.mulf %77, %18 : vector<2x32xf32>
    %79 = arith.maximumf %13, %48 : vector<2x32xf32>
    %80 = arith.maximumf %14, %78 : vector<2x32xf32>
    %81 = vector.extract_strided_slice %10 {offsets = [2, 0], sizes = [2, 96], strides = [1, 1]} : vector<16x192xf32> to vector<2x96xf32>
    %82 = vector.extract_strided_slice %10 {offsets = [12, 96], sizes = [2, 96], strides = [1, 1]} : vector<16x192xf32> to vector<2x96xf32>
    %83 = vector.extract_strided_slice %1 {offsets = [2, 0], sizes = [2, 32], strides = [1, 1]} : vector<16x32xf32> to vector<2x32xf32>
    %84 = vector.extract_strided_slice %1 {offsets = [12, 0], sizes = [2, 32], strides = [1, 1]} : vector<16x32xf32> to vector<2x32xf32>
    %cst_27 = arith.constant dense<0.000000e+00> : vector<2x96xf32>
    %85 = tpu.matmul %47, %2, %cst_27 {dimension_numbers = #tpu.dot_dimension_numbers<[1], [0], [0], [1], [0, 0, 1, 1], [], []>} : vector<2x32xf32>, vector<32x96xf32>, vector<2x96xf32> -> vector<2x96xf32>
    %86 = vector.broadcast %3 : vector<1x96xf32> to vector<2x96xf32>
    %87 = arith.addf %85, %86 : vector<2x96xf32>
    %88 = arith.addf %81, %87 : vector<2x96xf32>
    %89 = vector.extract_strided_slice %88 {offsets = [0, 0], sizes = [2, 32], strides = [1, 1]} : vector<2x96xf32> to vector<2x32xf32>
    %90 = arith.negf %89 : vector<2x32xf32>
    %91 = math.exp %90 : vector<2x32xf32>
    %cst_28 = arith.constant 1.000000e+00 : f32
    %92 = vector.broadcast %cst_28 : f32 to vector<2x32xf32>
    %93 = arith.addf %92, %91 : vector<2x32xf32>
    %94 = arith.divf %92, %93 : vector<2x32xf32>
    %95 = vector.extract_strided_slice %88 {offsets = [0, 32], sizes = [2, 32], strides = [1, 1]} : vector<2x96xf32> to vector<2x32xf32>
    %96 = arith.negf %95 : vector<2x32xf32>
    %97 = math.exp %96 : vector<2x32xf32>
    %cst_29 = arith.constant 1.000000e+00 : f32
    %98 = vector.broadcast %cst_29 : f32 to vector<2x32xf32>
    %99 = arith.addf %98, %97 : vector<2x32xf32>
    %100 = arith.divf %98, %99 : vector<2x32xf32>
    %101 = vector.extract_strided_slice %81 {offsets = [0, 64], sizes = [2, 32], strides = [1, 1]} : vector<2x96xf32> to vector<2x32xf32>
    %102 = vector.extract_strided_slice %87 {offsets = [0, 64], sizes = [2, 32], strides = [1, 1]} : vector<2x96xf32> to vector<2x32xf32>
    %103 = arith.mulf %94, %102 : vector<2x32xf32>
    %104 = arith.addf %101, %103 : vector<2x32xf32>
    %105 = math.tanh %104 : vector<2x32xf32>
    %cst_30 = arith.constant 1.000000e+00 : f32
    %106 = vector.broadcast %cst_30 : f32 to vector<2x32xf32>
    %107 = arith.subf %106, %100 : vector<2x32xf32>
    %108 = arith.mulf %107, %105 : vector<2x32xf32>
    %109 = arith.mulf %100, %47 : vector<2x32xf32>
    %110 = arith.addf %108, %109 : vector<2x32xf32>
    %111 = arith.subf %110, %47 : vector<2x32xf32>
    %112 = arith.mulf %83, %111 : vector<2x32xf32>
    %113 = arith.addf %47, %112 : vector<2x32xf32>
    %114 = arith.mulf %113, %83 : vector<2x32xf32>
    %cst_31 = arith.constant dense<0.000000e+00> : vector<2x96xf32>
    %115 = tpu.matmul %77, %4, %cst_31 {dimension_numbers = #tpu.dot_dimension_numbers<[1], [0], [0], [1], [0, 0, 1, 1], [], []>} : vector<2x32xf32>, vector<32x96xf32>, vector<2x96xf32> -> vector<2x96xf32>
    %116 = vector.broadcast %5 : vector<1x96xf32> to vector<2x96xf32>
    %117 = arith.addf %115, %116 : vector<2x96xf32>
    %118 = arith.addf %82, %117 : vector<2x96xf32>
    %119 = vector.extract_strided_slice %118 {offsets = [0, 0], sizes = [2, 32], strides = [1, 1]} : vector<2x96xf32> to vector<2x32xf32>
    %120 = arith.negf %119 : vector<2x32xf32>
    %121 = math.exp %120 : vector<2x32xf32>
    %cst_32 = arith.constant 1.000000e+00 : f32
    %122 = vector.broadcast %cst_32 : f32 to vector<2x32xf32>
    %123 = arith.addf %122, %121 : vector<2x32xf32>
    %124 = arith.divf %122, %123 : vector<2x32xf32>
    %125 = vector.extract_strided_slice %118 {offsets = [0, 32], sizes = [2, 32], strides = [1, 1]} : vector<2x96xf32> to vector<2x32xf32>
    %126 = arith.negf %125 : vector<2x32xf32>
    %127 = math.exp %126 : vector<2x32xf32>
    %cst_33 = arith.constant 1.000000e+00 : f32
    %128 = vector.broadcast %cst_33 : f32 to vector<2x32xf32>
    %129 = arith.addf %128, %127 : vector<2x32xf32>
    %130 = arith.divf %128, %129 : vector<2x32xf32>
    %131 = vector.extract_strided_slice %82 {offsets = [0, 64], sizes = [2, 32], strides = [1, 1]} : vector<2x96xf32> to vector<2x32xf32>
    %132 = vector.extract_strided_slice %117 {offsets = [0, 64], sizes = [2, 32], strides = [1, 1]} : vector<2x96xf32> to vector<2x32xf32>
    %133 = arith.mulf %124, %132 : vector<2x32xf32>
    %134 = arith.addf %131, %133 : vector<2x32xf32>
    %135 = math.tanh %134 : vector<2x32xf32>
    %cst_34 = arith.constant 1.000000e+00 : f32
    %136 = vector.broadcast %cst_34 : f32 to vector<2x32xf32>
    %137 = arith.subf %136, %130 : vector<2x32xf32>
    %138 = arith.mulf %137, %135 : vector<2x32xf32>
    %139 = arith.mulf %130, %77 : vector<2x32xf32>
    %140 = arith.addf %138, %139 : vector<2x32xf32>
    %141 = arith.subf %140, %77 : vector<2x32xf32>
    %142 = arith.mulf %84, %141 : vector<2x32xf32>
    %143 = arith.addf %77, %142 : vector<2x32xf32>
    %144 = arith.mulf %143, %84 : vector<2x32xf32>
    %145 = arith.maximumf %79, %114 : vector<2x32xf32>
    %146 = arith.maximumf %80, %144 : vector<2x32xf32>
    %147 = vector.extract_strided_slice %10 {offsets = [4, 0], sizes = [2, 96], strides = [1, 1]} : vector<16x192xf32> to vector<2x96xf32>
    %148 = vector.extract_strided_slice %10 {offsets = [10, 96], sizes = [2, 96], strides = [1, 1]} : vector<16x192xf32> to vector<2x96xf32>
    %149 = vector.extract_strided_slice %1 {offsets = [4, 0], sizes = [2, 32], strides = [1, 1]} : vector<16x32xf32> to vector<2x32xf32>
    %150 = vector.extract_strided_slice %1 {offsets = [10, 0], sizes = [2, 32], strides = [1, 1]} : vector<16x32xf32> to vector<2x32xf32>
    %cst_35 = arith.constant dense<0.000000e+00> : vector<2x96xf32>
    %151 = tpu.matmul %113, %2, %cst_35 {dimension_numbers = #tpu.dot_dimension_numbers<[1], [0], [0], [1], [0, 0, 1, 1], [], []>} : vector<2x32xf32>, vector<32x96xf32>, vector<2x96xf32> -> vector<2x96xf32>
    %152 = vector.broadcast %3 : vector<1x96xf32> to vector<2x96xf32>
    %153 = arith.addf %151, %152 : vector<2x96xf32>
    %154 = arith.addf %147, %153 : vector<2x96xf32>
    %155 = vector.extract_strided_slice %154 {offsets = [0, 0], sizes = [2, 32], strides = [1, 1]} : vector<2x96xf32> to vector<2x32xf32>
    %156 = arith.negf %155 : vector<2x32xf32>
    %157 = math.exp %156 : vector<2x32xf32>
    %cst_36 = arith.constant 1.000000e+00 : f32
    %158 = vector.broadcast %cst_36 : f32 to vector<2x32xf32>
    %159 = arith.addf %158, %157 : vector<2x32xf32>
    %160 = arith.divf %158, %159 : vector<2x32xf32>
    %161 = vector.extract_strided_slice %154 {offsets = [0, 32], sizes = [2, 32], strides = [1, 1]} : vector<2x96xf32> to vector<2x32xf32>
    %162 = arith.negf %161 : vector<2x32xf32>
    %163 = math.exp %162 : vector<2x32xf32>
    %cst_37 = arith.constant 1.000000e+00 : f32
    %164 = vector.broadcast %cst_37 : f32 to vector<2x32xf32>
    %165 = arith.addf %164, %163 : vector<2x32xf32>
    %166 = arith.divf %164, %165 : vector<2x32xf32>
    %167 = vector.extract_strided_slice %147 {offsets = [0, 64], sizes = [2, 32], strides = [1, 1]} : vector<2x96xf32> to vector<2x32xf32>
    %168 = vector.extract_strided_slice %153 {offsets = [0, 64], sizes = [2, 32], strides = [1, 1]} : vector<2x96xf32> to vector<2x32xf32>
    %169 = arith.mulf %160, %168 : vector<2x32xf32>
    %170 = arith.addf %167, %169 : vector<2x32xf32>
    %171 = math.tanh %170 : vector<2x32xf32>
    %cst_38 = arith.constant 1.000000e+00 : f32
    %172 = vector.broadcast %cst_38 : f32 to vector<2x32xf32>
    %173 = arith.subf %172, %166 : vector<2x32xf32>
    %174 = arith.mulf %173, %171 : vector<2x32xf32>
    %175 = arith.mulf %166, %113 : vector<2x32xf32>
    %176 = arith.addf %174, %175 : vector<2x32xf32>
    %177 = arith.subf %176, %113 : vector<2x32xf32>
    %178 = arith.mulf %149, %177 : vector<2x32xf32>
    %179 = arith.addf %113, %178 : vector<2x32xf32>
    %180 = arith.mulf %179, %149 : vector<2x32xf32>
    %cst_39 = arith.constant dense<0.000000e+00> : vector<2x96xf32>
    %181 = tpu.matmul %143, %4, %cst_39 {dimension_numbers = #tpu.dot_dimension_numbers<[1], [0], [0], [1], [0, 0, 1, 1], [], []>} : vector<2x32xf32>, vector<32x96xf32>, vector<2x96xf32> -> vector<2x96xf32>
    %182 = vector.broadcast %5 : vector<1x96xf32> to vector<2x96xf32>
    %183 = arith.addf %181, %182 : vector<2x96xf32>
    %184 = arith.addf %148, %183 : vector<2x96xf32>
    %185 = vector.extract_strided_slice %184 {offsets = [0, 0], sizes = [2, 32], strides = [1, 1]} : vector<2x96xf32> to vector<2x32xf32>
    %186 = arith.negf %185 : vector<2x32xf32>
    %187 = math.exp %186 : vector<2x32xf32>
    %cst_40 = arith.constant 1.000000e+00 : f32
    %188 = vector.broadcast %cst_40 : f32 to vector<2x32xf32>
    %189 = arith.addf %188, %187 : vector<2x32xf32>
    %190 = arith.divf %188, %189 : vector<2x32xf32>
    %191 = vector.extract_strided_slice %184 {offsets = [0, 32], sizes = [2, 32], strides = [1, 1]} : vector<2x96xf32> to vector<2x32xf32>
    %192 = arith.negf %191 : vector<2x32xf32>
    %193 = math.exp %192 : vector<2x32xf32>
    %cst_41 = arith.constant 1.000000e+00 : f32
    %194 = vector.broadcast %cst_41 : f32 to vector<2x32xf32>
    %195 = arith.addf %194, %193 : vector<2x32xf32>
    %196 = arith.divf %194, %195 : vector<2x32xf32>
    %197 = vector.extract_strided_slice %148 {offsets = [0, 64], sizes = [2, 32], strides = [1, 1]} : vector<2x96xf32> to vector<2x32xf32>
    %198 = vector.extract_strided_slice %183 {offsets = [0, 64], sizes = [2, 32], strides = [1, 1]} : vector<2x96xf32> to vector<2x32xf32>
    %199 = arith.mulf %190, %198 : vector<2x32xf32>
    %200 = arith.addf %197, %199 : vector<2x32xf32>
    %201 = math.tanh %200 : vector<2x32xf32>
    %cst_42 = arith.constant 1.000000e+00 : f32
    %202 = vector.broadcast %cst_42 : f32 to vector<2x32xf32>
    %203 = arith.subf %202, %196 : vector<2x32xf32>
    %204 = arith.mulf %203, %201 : vector<2x32xf32>
    %205 = arith.mulf %196, %143 : vector<2x32xf32>
    %206 = arith.addf %204, %205 : vector<2x32xf32>
    %207 = arith.subf %206, %143 : vector<2x32xf32>
    %208 = arith.mulf %150, %207 : vector<2x32xf32>
    %209 = arith.addf %143, %208 : vector<2x32xf32>
    %210 = arith.mulf %209, %150 : vector<2x32xf32>
    %211 = arith.maximumf %145, %180 : vector<2x32xf32>
    %212 = arith.maximumf %146, %210 : vector<2x32xf32>
    %213 = vector.extract_strided_slice %10 {offsets = [6, 0], sizes = [2, 96], strides = [1, 1]} : vector<16x192xf32> to vector<2x96xf32>
    %214 = vector.extract_strided_slice %10 {offsets = [8, 96], sizes = [2, 96], strides = [1, 1]} : vector<16x192xf32> to vector<2x96xf32>
    %215 = vector.extract_strided_slice %1 {offsets = [6, 0], sizes = [2, 32], strides = [1, 1]} : vector<16x32xf32> to vector<2x32xf32>
    %216 = vector.extract_strided_slice %1 {offsets = [8, 0], sizes = [2, 32], strides = [1, 1]} : vector<16x32xf32> to vector<2x32xf32>
    %cst_43 = arith.constant dense<0.000000e+00> : vector<2x96xf32>
    %217 = tpu.matmul %179, %2, %cst_43 {dimension_numbers = #tpu.dot_dimension_numbers<[1], [0], [0], [1], [0, 0, 1, 1], [], []>} : vector<2x32xf32>, vector<32x96xf32>, vector<2x96xf32> -> vector<2x96xf32>
    %218 = vector.broadcast %3 : vector<1x96xf32> to vector<2x96xf32>
    %219 = arith.addf %217, %218 : vector<2x96xf32>
    %220 = arith.addf %213, %219 : vector<2x96xf32>
    %221 = vector.extract_strided_slice %220 {offsets = [0, 0], sizes = [2, 32], strides = [1, 1]} : vector<2x96xf32> to vector<2x32xf32>
    %222 = arith.negf %221 : vector<2x32xf32>
    %223 = math.exp %222 : vector<2x32xf32>
    %cst_44 = arith.constant 1.000000e+00 : f32
    %224 = vector.broadcast %cst_44 : f32 to vector<2x32xf32>
    %225 = arith.addf %224, %223 : vector<2x32xf32>
    %226 = arith.divf %224, %225 : vector<2x32xf32>
    %227 = vector.extract_strided_slice %220 {offsets = [0, 32], sizes = [2, 32], strides = [1, 1]} : vector<2x96xf32> to vector<2x32xf32>
    %228 = arith.negf %227 : vector<2x32xf32>
    %229 = math.exp %228 : vector<2x32xf32>
    %cst_45 = arith.constant 1.000000e+00 : f32
    %230 = vector.broadcast %cst_45 : f32 to vector<2x32xf32>
    %231 = arith.addf %230, %229 : vector<2x32xf32>
    %232 = arith.divf %230, %231 : vector<2x32xf32>
    %233 = vector.extract_strided_slice %213 {offsets = [0, 64], sizes = [2, 32], strides = [1, 1]} : vector<2x96xf32> to vector<2x32xf32>
    %234 = vector.extract_strided_slice %219 {offsets = [0, 64], sizes = [2, 32], strides = [1, 1]} : vector<2x96xf32> to vector<2x32xf32>
    %235 = arith.mulf %226, %234 : vector<2x32xf32>
    %236 = arith.addf %233, %235 : vector<2x32xf32>
    %237 = math.tanh %236 : vector<2x32xf32>
    %cst_46 = arith.constant 1.000000e+00 : f32
    %238 = vector.broadcast %cst_46 : f32 to vector<2x32xf32>
    %239 = arith.subf %238, %232 : vector<2x32xf32>
    %240 = arith.mulf %239, %237 : vector<2x32xf32>
    %241 = arith.mulf %232, %179 : vector<2x32xf32>
    %242 = arith.addf %240, %241 : vector<2x32xf32>
    %243 = arith.subf %242, %179 : vector<2x32xf32>
    %244 = arith.mulf %215, %243 : vector<2x32xf32>
    %245 = arith.addf %179, %244 : vector<2x32xf32>
    %246 = arith.mulf %245, %215 : vector<2x32xf32>
    %cst_47 = arith.constant dense<0.000000e+00> : vector<2x96xf32>
    %247 = tpu.matmul %209, %4, %cst_47 {dimension_numbers = #tpu.dot_dimension_numbers<[1], [0], [0], [1], [0, 0, 1, 1], [], []>} : vector<2x32xf32>, vector<32x96xf32>, vector<2x96xf32> -> vector<2x96xf32>
    %248 = vector.broadcast %5 : vector<1x96xf32> to vector<2x96xf32>
    %249 = arith.addf %247, %248 : vector<2x96xf32>
    %250 = arith.addf %214, %249 : vector<2x96xf32>
    %251 = vector.extract_strided_slice %250 {offsets = [0, 0], sizes = [2, 32], strides = [1, 1]} : vector<2x96xf32> to vector<2x32xf32>
    %252 = arith.negf %251 : vector<2x32xf32>
    %253 = math.exp %252 : vector<2x32xf32>
    %cst_48 = arith.constant 1.000000e+00 : f32
    %254 = vector.broadcast %cst_48 : f32 to vector<2x32xf32>
    %255 = arith.addf %254, %253 : vector<2x32xf32>
    %256 = arith.divf %254, %255 : vector<2x32xf32>
    %257 = vector.extract_strided_slice %250 {offsets = [0, 32], sizes = [2, 32], strides = [1, 1]} : vector<2x96xf32> to vector<2x32xf32>
    %258 = arith.negf %257 : vector<2x32xf32>
    %259 = math.exp %258 : vector<2x32xf32>
    %cst_49 = arith.constant 1.000000e+00 : f32
    %260 = vector.broadcast %cst_49 : f32 to vector<2x32xf32>
    %261 = arith.addf %260, %259 : vector<2x32xf32>
    %262 = arith.divf %260, %261 : vector<2x32xf32>
    %263 = vector.extract_strided_slice %214 {offsets = [0, 64], sizes = [2, 32], strides = [1, 1]} : vector<2x96xf32> to vector<2x32xf32>
    %264 = vector.extract_strided_slice %249 {offsets = [0, 64], sizes = [2, 32], strides = [1, 1]} : vector<2x96xf32> to vector<2x32xf32>
    %265 = arith.mulf %256, %264 : vector<2x32xf32>
    %266 = arith.addf %263, %265 : vector<2x32xf32>
    %267 = math.tanh %266 : vector<2x32xf32>
    %cst_50 = arith.constant 1.000000e+00 : f32
    %268 = vector.broadcast %cst_50 : f32 to vector<2x32xf32>
    %269 = arith.subf %268, %262 : vector<2x32xf32>
    %270 = arith.mulf %269, %267 : vector<2x32xf32>
    %271 = arith.mulf %262, %209 : vector<2x32xf32>
    %272 = arith.addf %270, %271 : vector<2x32xf32>
    %273 = arith.subf %272, %209 : vector<2x32xf32>
    %274 = arith.mulf %216, %273 : vector<2x32xf32>
    %275 = arith.addf %209, %274 : vector<2x32xf32>
    %276 = arith.mulf %275, %216 : vector<2x32xf32>
    %277 = arith.maximumf %211, %246 : vector<2x32xf32>
    %278 = arith.maximumf %212, %276 : vector<2x32xf32>
    %279 = vector.extract_strided_slice %10 {offsets = [8, 0], sizes = [2, 96], strides = [1, 1]} : vector<16x192xf32> to vector<2x96xf32>
    %280 = vector.extract_strided_slice %10 {offsets = [6, 96], sizes = [2, 96], strides = [1, 1]} : vector<16x192xf32> to vector<2x96xf32>
    %281 = vector.extract_strided_slice %1 {offsets = [8, 0], sizes = [2, 32], strides = [1, 1]} : vector<16x32xf32> to vector<2x32xf32>
    %282 = vector.extract_strided_slice %1 {offsets = [6, 0], sizes = [2, 32], strides = [1, 1]} : vector<16x32xf32> to vector<2x32xf32>
    %cst_51 = arith.constant dense<0.000000e+00> : vector<2x96xf32>
    %283 = tpu.matmul %245, %2, %cst_51 {dimension_numbers = #tpu.dot_dimension_numbers<[1], [0], [0], [1], [0, 0, 1, 1], [], []>} : vector<2x32xf32>, vector<32x96xf32>, vector<2x96xf32> -> vector<2x96xf32>
    %284 = vector.broadcast %3 : vector<1x96xf32> to vector<2x96xf32>
    %285 = arith.addf %283, %284 : vector<2x96xf32>
    %286 = arith.addf %279, %285 : vector<2x96xf32>
    %287 = vector.extract_strided_slice %286 {offsets = [0, 0], sizes = [2, 32], strides = [1, 1]} : vector<2x96xf32> to vector<2x32xf32>
    %288 = arith.negf %287 : vector<2x32xf32>
    %289 = math.exp %288 : vector<2x32xf32>
    %cst_52 = arith.constant 1.000000e+00 : f32
    %290 = vector.broadcast %cst_52 : f32 to vector<2x32xf32>
    %291 = arith.addf %290, %289 : vector<2x32xf32>
    %292 = arith.divf %290, %291 : vector<2x32xf32>
    %293 = vector.extract_strided_slice %286 {offsets = [0, 32], sizes = [2, 32], strides = [1, 1]} : vector<2x96xf32> to vector<2x32xf32>
    %294 = arith.negf %293 : vector<2x32xf32>
    %295 = math.exp %294 : vector<2x32xf32>
    %cst_53 = arith.constant 1.000000e+00 : f32
    %296 = vector.broadcast %cst_53 : f32 to vector<2x32xf32>
    %297 = arith.addf %296, %295 : vector<2x32xf32>
    %298 = arith.divf %296, %297 : vector<2x32xf32>
    %299 = vector.extract_strided_slice %279 {offsets = [0, 64], sizes = [2, 32], strides = [1, 1]} : vector<2x96xf32> to vector<2x32xf32>
    %300 = vector.extract_strided_slice %285 {offsets = [0, 64], sizes = [2, 32], strides = [1, 1]} : vector<2x96xf32> to vector<2x32xf32>
    %301 = arith.mulf %292, %300 : vector<2x32xf32>
    %302 = arith.addf %299, %301 : vector<2x32xf32>
    %303 = math.tanh %302 : vector<2x32xf32>
    %cst_54 = arith.constant 1.000000e+00 : f32
    %304 = vector.broadcast %cst_54 : f32 to vector<2x32xf32>
    %305 = arith.subf %304, %298 : vector<2x32xf32>
    %306 = arith.mulf %305, %303 : vector<2x32xf32>
    %307 = arith.mulf %298, %245 : vector<2x32xf32>
    %308 = arith.addf %306, %307 : vector<2x32xf32>
    %309 = arith.subf %308, %245 : vector<2x32xf32>
    %310 = arith.mulf %281, %309 : vector<2x32xf32>
    %311 = arith.addf %245, %310 : vector<2x32xf32>
    %312 = arith.mulf %311, %281 : vector<2x32xf32>
    %cst_55 = arith.constant dense<0.000000e+00> : vector<2x96xf32>
    %313 = tpu.matmul %275, %4, %cst_55 {dimension_numbers = #tpu.dot_dimension_numbers<[1], [0], [0], [1], [0, 0, 1, 1], [], []>} : vector<2x32xf32>, vector<32x96xf32>, vector<2x96xf32> -> vector<2x96xf32>
    %314 = vector.broadcast %5 : vector<1x96xf32> to vector<2x96xf32>
    %315 = arith.addf %313, %314 : vector<2x96xf32>
    %316 = arith.addf %280, %315 : vector<2x96xf32>
    %317 = vector.extract_strided_slice %316 {offsets = [0, 0], sizes = [2, 32], strides = [1, 1]} : vector<2x96xf32> to vector<2x32xf32>
    %318 = arith.negf %317 : vector<2x32xf32>
    %319 = math.exp %318 : vector<2x32xf32>
    %cst_56 = arith.constant 1.000000e+00 : f32
    %320 = vector.broadcast %cst_56 : f32 to vector<2x32xf32>
    %321 = arith.addf %320, %319 : vector<2x32xf32>
    %322 = arith.divf %320, %321 : vector<2x32xf32>
    %323 = vector.extract_strided_slice %316 {offsets = [0, 32], sizes = [2, 32], strides = [1, 1]} : vector<2x96xf32> to vector<2x32xf32>
    %324 = arith.negf %323 : vector<2x32xf32>
    %325 = math.exp %324 : vector<2x32xf32>
    %cst_57 = arith.constant 1.000000e+00 : f32
    %326 = vector.broadcast %cst_57 : f32 to vector<2x32xf32>
    %327 = arith.addf %326, %325 : vector<2x32xf32>
    %328 = arith.divf %326, %327 : vector<2x32xf32>
    %329 = vector.extract_strided_slice %280 {offsets = [0, 64], sizes = [2, 32], strides = [1, 1]} : vector<2x96xf32> to vector<2x32xf32>
    %330 = vector.extract_strided_slice %315 {offsets = [0, 64], sizes = [2, 32], strides = [1, 1]} : vector<2x96xf32> to vector<2x32xf32>
    %331 = arith.mulf %322, %330 : vector<2x32xf32>
    %332 = arith.addf %329, %331 : vector<2x32xf32>
    %333 = math.tanh %332 : vector<2x32xf32>
    %cst_58 = arith.constant 1.000000e+00 : f32
    %334 = vector.broadcast %cst_58 : f32 to vector<2x32xf32>
    %335 = arith.subf %334, %328 : vector<2x32xf32>
    %336 = arith.mulf %335, %333 : vector<2x32xf32>
    %337 = arith.mulf %328, %275 : vector<2x32xf32>
    %338 = arith.addf %336, %337 : vector<2x32xf32>
    %339 = arith.subf %338, %275 : vector<2x32xf32>
    %340 = arith.mulf %282, %339 : vector<2x32xf32>
    %341 = arith.addf %275, %340 : vector<2x32xf32>
    %342 = arith.mulf %341, %282 : vector<2x32xf32>
    %343 = arith.maximumf %277, %312 : vector<2x32xf32>
    %344 = arith.maximumf %278, %342 : vector<2x32xf32>
    %345 = vector.extract_strided_slice %10 {offsets = [10, 0], sizes = [2, 96], strides = [1, 1]} : vector<16x192xf32> to vector<2x96xf32>
    %346 = vector.extract_strided_slice %10 {offsets = [4, 96], sizes = [2, 96], strides = [1, 1]} : vector<16x192xf32> to vector<2x96xf32>
    %347 = vector.extract_strided_slice %1 {offsets = [10, 0], sizes = [2, 32], strides = [1, 1]} : vector<16x32xf32> to vector<2x32xf32>
    %348 = vector.extract_strided_slice %1 {offsets = [4, 0], sizes = [2, 32], strides = [1, 1]} : vector<16x32xf32> to vector<2x32xf32>
    %cst_59 = arith.constant dense<0.000000e+00> : vector<2x96xf32>
    %349 = tpu.matmul %311, %2, %cst_59 {dimension_numbers = #tpu.dot_dimension_numbers<[1], [0], [0], [1], [0, 0, 1, 1], [], []>} : vector<2x32xf32>, vector<32x96xf32>, vector<2x96xf32> -> vector<2x96xf32>
    %350 = vector.broadcast %3 : vector<1x96xf32> to vector<2x96xf32>
    %351 = arith.addf %349, %350 : vector<2x96xf32>
    %352 = arith.addf %345, %351 : vector<2x96xf32>
    %353 = vector.extract_strided_slice %352 {offsets = [0, 0], sizes = [2, 32], strides = [1, 1]} : vector<2x96xf32> to vector<2x32xf32>
    %354 = arith.negf %353 : vector<2x32xf32>
    %355 = math.exp %354 : vector<2x32xf32>
    %cst_60 = arith.constant 1.000000e+00 : f32
    %356 = vector.broadcast %cst_60 : f32 to vector<2x32xf32>
    %357 = arith.addf %356, %355 : vector<2x32xf32>
    %358 = arith.divf %356, %357 : vector<2x32xf32>
    %359 = vector.extract_strided_slice %352 {offsets = [0, 32], sizes = [2, 32], strides = [1, 1]} : vector<2x96xf32> to vector<2x32xf32>
    %360 = arith.negf %359 : vector<2x32xf32>
    %361 = math.exp %360 : vector<2x32xf32>
    %cst_61 = arith.constant 1.000000e+00 : f32
    %362 = vector.broadcast %cst_61 : f32 to vector<2x32xf32>
    %363 = arith.addf %362, %361 : vector<2x32xf32>
    %364 = arith.divf %362, %363 : vector<2x32xf32>
    %365 = vector.extract_strided_slice %345 {offsets = [0, 64], sizes = [2, 32], strides = [1, 1]} : vector<2x96xf32> to vector<2x32xf32>
    %366 = vector.extract_strided_slice %351 {offsets = [0, 64], sizes = [2, 32], strides = [1, 1]} : vector<2x96xf32> to vector<2x32xf32>
    %367 = arith.mulf %358, %366 : vector<2x32xf32>
    %368 = arith.addf %365, %367 : vector<2x32xf32>
    %369 = math.tanh %368 : vector<2x32xf32>
    %cst_62 = arith.constant 1.000000e+00 : f32
    %370 = vector.broadcast %cst_62 : f32 to vector<2x32xf32>
    %371 = arith.subf %370, %364 : vector<2x32xf32>
    %372 = arith.mulf %371, %369 : vector<2x32xf32>
    %373 = arith.mulf %364, %311 : vector<2x32xf32>
    %374 = arith.addf %372, %373 : vector<2x32xf32>
    %375 = arith.subf %374, %311 : vector<2x32xf32>
    %376 = arith.mulf %347, %375 : vector<2x32xf32>
    %377 = arith.addf %311, %376 : vector<2x32xf32>
    %378 = arith.mulf %377, %347 : vector<2x32xf32>
    %cst_63 = arith.constant dense<0.000000e+00> : vector<2x96xf32>
    %379 = tpu.matmul %341, %4, %cst_63 {dimension_numbers = #tpu.dot_dimension_numbers<[1], [0], [0], [1], [0, 0, 1, 1], [], []>} : vector<2x32xf32>, vector<32x96xf32>, vector<2x96xf32> -> vector<2x96xf32>
    %380 = vector.broadcast %5 : vector<1x96xf32> to vector<2x96xf32>
    %381 = arith.addf %379, %380 : vector<2x96xf32>
    %382 = arith.addf %346, %381 : vector<2x96xf32>
    %383 = vector.extract_strided_slice %382 {offsets = [0, 0], sizes = [2, 32], strides = [1, 1]} : vector<2x96xf32> to vector<2x32xf32>
    %384 = arith.negf %383 : vector<2x32xf32>
    %385 = math.exp %384 : vector<2x32xf32>
    %cst_64 = arith.constant 1.000000e+00 : f32
    %386 = vector.broadcast %cst_64 : f32 to vector<2x32xf32>
    %387 = arith.addf %386, %385 : vector<2x32xf32>
    %388 = arith.divf %386, %387 : vector<2x32xf32>
    %389 = vector.extract_strided_slice %382 {offsets = [0, 32], sizes = [2, 32], strides = [1, 1]} : vector<2x96xf32> to vector<2x32xf32>
    %390 = arith.negf %389 : vector<2x32xf32>
    %391 = math.exp %390 : vector<2x32xf32>
    %cst_65 = arith.constant 1.000000e+00 : f32
    %392 = vector.broadcast %cst_65 : f32 to vector<2x32xf32>
    %393 = arith.addf %392, %391 : vector<2x32xf32>
    %394 = arith.divf %392, %393 : vector<2x32xf32>
    %395 = vector.extract_strided_slice %346 {offsets = [0, 64], sizes = [2, 32], strides = [1, 1]} : vector<2x96xf32> to vector<2x32xf32>
    %396 = vector.extract_strided_slice %381 {offsets = [0, 64], sizes = [2, 32], strides = [1, 1]} : vector<2x96xf32> to vector<2x32xf32>
    %397 = arith.mulf %388, %396 : vector<2x32xf32>
    %398 = arith.addf %395, %397 : vector<2x32xf32>
    %399 = math.tanh %398 : vector<2x32xf32>
    %cst_66 = arith.constant 1.000000e+00 : f32
    %400 = vector.broadcast %cst_66 : f32 to vector<2x32xf32>
    %401 = arith.subf %400, %394 : vector<2x32xf32>
    %402 = arith.mulf %401, %399 : vector<2x32xf32>
    %403 = arith.mulf %394, %341 : vector<2x32xf32>
    %404 = arith.addf %402, %403 : vector<2x32xf32>
    %405 = arith.subf %404, %341 : vector<2x32xf32>
    %406 = arith.mulf %348, %405 : vector<2x32xf32>
    %407 = arith.addf %341, %406 : vector<2x32xf32>
    %408 = arith.mulf %407, %348 : vector<2x32xf32>
    %409 = arith.maximumf %343, %378 : vector<2x32xf32>
    %410 = arith.maximumf %344, %408 : vector<2x32xf32>
    %411 = vector.extract_strided_slice %10 {offsets = [12, 0], sizes = [2, 96], strides = [1, 1]} : vector<16x192xf32> to vector<2x96xf32>
    %412 = vector.extract_strided_slice %10 {offsets = [2, 96], sizes = [2, 96], strides = [1, 1]} : vector<16x192xf32> to vector<2x96xf32>
    %413 = vector.extract_strided_slice %1 {offsets = [12, 0], sizes = [2, 32], strides = [1, 1]} : vector<16x32xf32> to vector<2x32xf32>
    %414 = vector.extract_strided_slice %1 {offsets = [2, 0], sizes = [2, 32], strides = [1, 1]} : vector<16x32xf32> to vector<2x32xf32>
    %cst_67 = arith.constant dense<0.000000e+00> : vector<2x96xf32>
    %415 = tpu.matmul %377, %2, %cst_67 {dimension_numbers = #tpu.dot_dimension_numbers<[1], [0], [0], [1], [0, 0, 1, 1], [], []>} : vector<2x32xf32>, vector<32x96xf32>, vector<2x96xf32> -> vector<2x96xf32>
    %416 = vector.broadcast %3 : vector<1x96xf32> to vector<2x96xf32>
    %417 = arith.addf %415, %416 : vector<2x96xf32>
    %418 = arith.addf %411, %417 : vector<2x96xf32>
    %419 = vector.extract_strided_slice %418 {offsets = [0, 0], sizes = [2, 32], strides = [1, 1]} : vector<2x96xf32> to vector<2x32xf32>
    %420 = arith.negf %419 : vector<2x32xf32>
    %421 = math.exp %420 : vector<2x32xf32>
    %cst_68 = arith.constant 1.000000e+00 : f32
    %422 = vector.broadcast %cst_68 : f32 to vector<2x32xf32>
    %423 = arith.addf %422, %421 : vector<2x32xf32>
    %424 = arith.divf %422, %423 : vector<2x32xf32>
    %425 = vector.extract_strided_slice %418 {offsets = [0, 32], sizes = [2, 32], strides = [1, 1]} : vector<2x96xf32> to vector<2x32xf32>
    %426 = arith.negf %425 : vector<2x32xf32>
    %427 = math.exp %426 : vector<2x32xf32>
    %cst_69 = arith.constant 1.000000e+00 : f32
    %428 = vector.broadcast %cst_69 : f32 to vector<2x32xf32>
    %429 = arith.addf %428, %427 : vector<2x32xf32>
    %430 = arith.divf %428, %429 : vector<2x32xf32>
    %431 = vector.extract_strided_slice %411 {offsets = [0, 64], sizes = [2, 32], strides = [1, 1]} : vector<2x96xf32> to vector<2x32xf32>
    %432 = vector.extract_strided_slice %417 {offsets = [0, 64], sizes = [2, 32], strides = [1, 1]} : vector<2x96xf32> to vector<2x32xf32>
    %433 = arith.mulf %424, %432 : vector<2x32xf32>
    %434 = arith.addf %431, %433 : vector<2x32xf32>
    %435 = math.tanh %434 : vector<2x32xf32>
    %cst_70 = arith.constant 1.000000e+00 : f32
    %436 = vector.broadcast %cst_70 : f32 to vector<2x32xf32>
    %437 = arith.subf %436, %430 : vector<2x32xf32>
    %438 = arith.mulf %437, %435 : vector<2x32xf32>
    %439 = arith.mulf %430, %377 : vector<2x32xf32>
    %440 = arith.addf %438, %439 : vector<2x32xf32>
    %441 = arith.subf %440, %377 : vector<2x32xf32>
    %442 = arith.mulf %413, %441 : vector<2x32xf32>
    %443 = arith.addf %377, %442 : vector<2x32xf32>
    %444 = arith.mulf %443, %413 : vector<2x32xf32>
    %cst_71 = arith.constant dense<0.000000e+00> : vector<2x96xf32>
    %445 = tpu.matmul %407, %4, %cst_71 {dimension_numbers = #tpu.dot_dimension_numbers<[1], [0], [0], [1], [0, 0, 1, 1], [], []>} : vector<2x32xf32>, vector<32x96xf32>, vector<2x96xf32> -> vector<2x96xf32>
    %446 = vector.broadcast %5 : vector<1x96xf32> to vector<2x96xf32>
    %447 = arith.addf %445, %446 : vector<2x96xf32>
    %448 = arith.addf %412, %447 : vector<2x96xf32>
    %449 = vector.extract_strided_slice %448 {offsets = [0, 0], sizes = [2, 32], strides = [1, 1]} : vector<2x96xf32> to vector<2x32xf32>
    %450 = arith.negf %449 : vector<2x32xf32>
    %451 = math.exp %450 : vector<2x32xf32>
    %cst_72 = arith.constant 1.000000e+00 : f32
    %452 = vector.broadcast %cst_72 : f32 to vector<2x32xf32>
    %453 = arith.addf %452, %451 : vector<2x32xf32>
    %454 = arith.divf %452, %453 : vector<2x32xf32>
    %455 = vector.extract_strided_slice %448 {offsets = [0, 32], sizes = [2, 32], strides = [1, 1]} : vector<2x96xf32> to vector<2x32xf32>
    %456 = arith.negf %455 : vector<2x32xf32>
    %457 = math.exp %456 : vector<2x32xf32>
    %cst_73 = arith.constant 1.000000e+00 : f32
    %458 = vector.broadcast %cst_73 : f32 to vector<2x32xf32>
    %459 = arith.addf %458, %457 : vector<2x32xf32>
    %460 = arith.divf %458, %459 : vector<2x32xf32>
    %461 = vector.extract_strided_slice %412 {offsets = [0, 64], sizes = [2, 32], strides = [1, 1]} : vector<2x96xf32> to vector<2x32xf32>
    %462 = vector.extract_strided_slice %447 {offsets = [0, 64], sizes = [2, 32], strides = [1, 1]} : vector<2x96xf32> to vector<2x32xf32>
    %463 = arith.mulf %454, %462 : vector<2x32xf32>
    %464 = arith.addf %461, %463 : vector<2x32xf32>
    %465 = math.tanh %464 : vector<2x32xf32>
    %cst_74 = arith.constant 1.000000e+00 : f32
    %466 = vector.broadcast %cst_74 : f32 to vector<2x32xf32>
    %467 = arith.subf %466, %460 : vector<2x32xf32>
    %468 = arith.mulf %467, %465 : vector<2x32xf32>
    %469 = arith.mulf %460, %407 : vector<2x32xf32>
    %470 = arith.addf %468, %469 : vector<2x32xf32>
    %471 = arith.subf %470, %407 : vector<2x32xf32>
    %472 = arith.mulf %414, %471 : vector<2x32xf32>
    %473 = arith.addf %407, %472 : vector<2x32xf32>
    %474 = arith.mulf %473, %414 : vector<2x32xf32>
    %475 = arith.maximumf %409, %444 : vector<2x32xf32>
    %476 = arith.maximumf %410, %474 : vector<2x32xf32>
    %477 = vector.extract_strided_slice %10 {offsets = [14, 0], sizes = [2, 96], strides = [1, 1]} : vector<16x192xf32> to vector<2x96xf32>
    %478 = vector.extract_strided_slice %10 {offsets = [0, 96], sizes = [2, 96], strides = [1, 1]} : vector<16x192xf32> to vector<2x96xf32>
    %479 = vector.extract_strided_slice %1 {offsets = [14, 0], sizes = [2, 32], strides = [1, 1]} : vector<16x32xf32> to vector<2x32xf32>
    %480 = vector.extract_strided_slice %1 {offsets = [0, 0], sizes = [2, 32], strides = [1, 1]} : vector<16x32xf32> to vector<2x32xf32>
    %cst_75 = arith.constant dense<0.000000e+00> : vector<2x96xf32>
    %481 = tpu.matmul %443, %2, %cst_75 {dimension_numbers = #tpu.dot_dimension_numbers<[1], [0], [0], [1], [0, 0, 1, 1], [], []>} : vector<2x32xf32>, vector<32x96xf32>, vector<2x96xf32> -> vector<2x96xf32>
    %482 = vector.broadcast %3 : vector<1x96xf32> to vector<2x96xf32>
    %483 = arith.addf %481, %482 : vector<2x96xf32>
    %484 = arith.addf %477, %483 : vector<2x96xf32>
    %485 = vector.extract_strided_slice %484 {offsets = [0, 0], sizes = [2, 32], strides = [1, 1]} : vector<2x96xf32> to vector<2x32xf32>
    %486 = arith.negf %485 : vector<2x32xf32>
    %487 = math.exp %486 : vector<2x32xf32>
    %cst_76 = arith.constant 1.000000e+00 : f32
    %488 = vector.broadcast %cst_76 : f32 to vector<2x32xf32>
    %489 = arith.addf %488, %487 : vector<2x32xf32>
    %490 = arith.divf %488, %489 : vector<2x32xf32>
    %491 = vector.extract_strided_slice %484 {offsets = [0, 32], sizes = [2, 32], strides = [1, 1]} : vector<2x96xf32> to vector<2x32xf32>
    %492 = arith.negf %491 : vector<2x32xf32>
    %493 = math.exp %492 : vector<2x32xf32>
    %cst_77 = arith.constant 1.000000e+00 : f32
    %494 = vector.broadcast %cst_77 : f32 to vector<2x32xf32>
    %495 = arith.addf %494, %493 : vector<2x32xf32>
    %496 = arith.divf %494, %495 : vector<2x32xf32>
    %497 = vector.extract_strided_slice %477 {offsets = [0, 64], sizes = [2, 32], strides = [1, 1]} : vector<2x96xf32> to vector<2x32xf32>
    %498 = vector.extract_strided_slice %483 {offsets = [0, 64], sizes = [2, 32], strides = [1, 1]} : vector<2x96xf32> to vector<2x32xf32>
    %499 = arith.mulf %490, %498 : vector<2x32xf32>
    %500 = arith.addf %497, %499 : vector<2x32xf32>
    %501 = math.tanh %500 : vector<2x32xf32>
    %cst_78 = arith.constant 1.000000e+00 : f32
    %502 = vector.broadcast %cst_78 : f32 to vector<2x32xf32>
    %503 = arith.subf %502, %496 : vector<2x32xf32>
    %504 = arith.mulf %503, %501 : vector<2x32xf32>
    %505 = arith.mulf %496, %443 : vector<2x32xf32>
    %506 = arith.addf %504, %505 : vector<2x32xf32>
    %507 = arith.subf %506, %443 : vector<2x32xf32>
    %508 = arith.mulf %479, %507 : vector<2x32xf32>
    %509 = arith.addf %443, %508 : vector<2x32xf32>
    %510 = arith.mulf %509, %479 : vector<2x32xf32>
    %cst_79 = arith.constant dense<0.000000e+00> : vector<2x96xf32>
    %511 = tpu.matmul %473, %4, %cst_79 {dimension_numbers = #tpu.dot_dimension_numbers<[1], [0], [0], [1], [0, 0, 1, 1], [], []>} : vector<2x32xf32>, vector<32x96xf32>, vector<2x96xf32> -> vector<2x96xf32>
    %512 = vector.broadcast %5 : vector<1x96xf32> to vector<2x96xf32>
    %513 = arith.addf %511, %512 : vector<2x96xf32>
    %514 = arith.addf %478, %513 : vector<2x96xf32>
    %515 = vector.extract_strided_slice %514 {offsets = [0, 0], sizes = [2, 32], strides = [1, 1]} : vector<2x96xf32> to vector<2x32xf32>
    %516 = arith.negf %515 : vector<2x32xf32>
    %517 = math.exp %516 : vector<2x32xf32>
    %cst_80 = arith.constant 1.000000e+00 : f32
    %518 = vector.broadcast %cst_80 : f32 to vector<2x32xf32>
    %519 = arith.addf %518, %517 : vector<2x32xf32>
    %520 = arith.divf %518, %519 : vector<2x32xf32>
    %521 = vector.extract_strided_slice %514 {offsets = [0, 32], sizes = [2, 32], strides = [1, 1]} : vector<2x96xf32> to vector<2x32xf32>
    %522 = arith.negf %521 : vector<2x32xf32>
    %523 = math.exp %522 : vector<2x32xf32>
    %cst_81 = arith.constant 1.000000e+00 : f32
    %524 = vector.broadcast %cst_81 : f32 to vector<2x32xf32>
    %525 = arith.addf %524, %523 : vector<2x32xf32>
    %526 = arith.divf %524, %525 : vector<2x32xf32>
    %527 = vector.extract_strided_slice %478 {offsets = [0, 64], sizes = [2, 32], strides = [1, 1]} : vector<2x96xf32> to vector<2x32xf32>
    %528 = vector.extract_strided_slice %513 {offsets = [0, 64], sizes = [2, 32], strides = [1, 1]} : vector<2x96xf32> to vector<2x32xf32>
    %529 = arith.mulf %520, %528 : vector<2x32xf32>
    %530 = arith.addf %527, %529 : vector<2x32xf32>
    %531 = math.tanh %530 : vector<2x32xf32>
    %cst_82 = arith.constant 1.000000e+00 : f32
    %532 = vector.broadcast %cst_82 : f32 to vector<2x32xf32>
    %533 = arith.subf %532, %526 : vector<2x32xf32>
    %534 = arith.mulf %533, %531 : vector<2x32xf32>
    %535 = arith.mulf %526, %473 : vector<2x32xf32>
    %536 = arith.addf %534, %535 : vector<2x32xf32>
    %537 = arith.subf %536, %473 : vector<2x32xf32>
    %538 = arith.mulf %480, %537 : vector<2x32xf32>
    %539 = arith.addf %473, %538 : vector<2x32xf32>
    %540 = arith.mulf %539, %480 : vector<2x32xf32>
    %541 = arith.maximumf %475, %510 : vector<2x32xf32>
    %542 = arith.maximumf %476, %540 : vector<2x32xf32>
    %543 = tpu.concatenate %541, %542, %509, %539 in 1 : vector<2x32xf32>, vector<2x32xf32>, vector<2x32xf32>, vector<2x32xf32> -> vector<2x128xf32>
    %c0_83 = arith.constant 0 : index
    %c0_84 = arith.constant 0 : index
    %544 = vector.load %arg8[%c0_83, %c0_84] : memref<128x64xf32, #tpu.memory_space<vmem>>, vector<128x64xf32>
    %cst_85 = arith.constant dense<0.000000e+00> : vector<2x64xf32>
    %545 = tpu.matmul %543, %544, %cst_85 {dimension_numbers = #tpu.dot_dimension_numbers<[1], [0], [0], [1], [0, 0, 1, 1], [], []>} : vector<2x128xf32>, vector<128x64xf32>, vector<2x64xf32> -> vector<2x64xf32>
    %c0_86 = arith.constant 0 : index
    %c0_87 = arith.constant 0 : index
    %546 = vector.load %arg9[%c0_86, %c0_87] : memref<1x64xf32, #tpu.memory_space<vmem>>, vector<1x64xf32>
    %547 = vector.broadcast %546 : vector<1x64xf32> to vector<2x64xf32>
    %548 = arith.addf %545, %547 : vector<2x64xf32>
    %cst_88 = arith.constant 0.000000e+00 : f32
    %549 = vector.broadcast %cst_88 : f32 to vector<2x64xf32>
    %550 = arith.maximumf %548, %549 : vector<2x64xf32>
    %c0_89 = arith.constant 0 : index
    %c0_90 = arith.constant 0 : index
    %551 = vector.load %arg10[%c0_89, %c0_90] : memref<64x32xf32, #tpu.memory_space<vmem>>, vector<64x32xf32>
    %cst_91 = arith.constant dense<0.000000e+00> : vector<2x32xf32>
    %552 = tpu.matmul %550, %551, %cst_91 {dimension_numbers = #tpu.dot_dimension_numbers<[1], [0], [0], [1], [0, 0, 1, 1], [], []>} : vector<2x64xf32>, vector<64x32xf32>, vector<2x32xf32> -> vector<2x32xf32>
    %c0_92 = arith.constant 0 : index
    %c0_93 = arith.constant 0 : index
    %553 = vector.load %arg11[%c0_92, %c0_93] : memref<1x32xf32, #tpu.memory_space<vmem>>, vector<1x32xf32>
    %554 = vector.broadcast %553 : vector<1x32xf32> to vector<2x32xf32>
    %555 = arith.addf %552, %554 : vector<2x32xf32>
    %556 = vector.extract_strided_slice %555 {offsets = [0, 0], sizes = [2, 16], strides = [1, 1]} : vector<2x32xf32> to vector<2x16xf32>
    %c0_94 = arith.constant 0 : index
    %c0_95 = arith.constant 0 : index
    %557 = vector.load %arg12[%c0_94, %c0_95] : memref<2x16xf32, #tpu.memory_space<vmem>>, vector<2x16xf32>
    tpu.vector_store %arg12[%c0_94, %c0_95], %556 {strides = array<i32>} : memref<2x16xf32, #tpu.memory_space<vmem>>, vector<2x16xf32>,
    %558 = vector.extract_strided_slice %555 {offsets = [0, 16], sizes = [2, 16], strides = [1, 1]} : vector<2x32xf32> to vector<2x16xf32>
    %cst_96 = arith.constant 0.000000e+00 : f32
    %559 = vector.broadcast %cst_96 : f32 to vector<2x16xf32>
    %560 = arith.maximumf %558, %559 : vector<2x16xf32>
    %561 = math.absf %558 : vector<2x16xf32>
    %cst_97 = arith.constant 0.000000e+00 : f32
    %562 = vector.broadcast %cst_97 : f32 to vector<2x16xf32>
    %563 = arith.subf %562, %561 : vector<2x16xf32>
    %564 = math.exp %563 : vector<2x16xf32>
    %cst_98 = arith.constant 1.000000e+00 : f32
    %565 = vector.broadcast %cst_98 : f32 to vector<2x16xf32>
    %566 = arith.addf %565, %564 : vector<2x16xf32>
    %567 = math.log %566 : vector<2x16xf32>
    %568 = arith.addf %560, %567 : vector<2x16xf32>
    %c0_99 = arith.constant 0 : index
    %c0_100 = arith.constant 0 : index
    %569 = vector.load %arg13[%c0_99, %c0_100] : memref<2x16xf32, #tpu.memory_space<vmem>>, vector<2x16xf32>
    tpu.vector_store %arg13[%c0_99, %c0_100], %568 {strides = array<i32>} : memref<2x16xf32, #tpu.memory_space<vmem>>, vector<2x16xf32>,
    return
  }
}

</mosaic_0001>

<bundles_post_ra>
// kernel: inference_model.1
= control target key start
LH: loop header
LB: loop body
LE: loop exit
PB: predicated region body
PF: predicated region fallthrough
CT: control target
= control target key end

     0   :  { %19 = vsyncpa [#allocation3], 0  ;;  %vm73_vm0 = vcmask 261120   ;;  %s2577_s0 = inlined_call_operand.vmem [shape: f32[16,32], index: 0, kind: input, shape index: {}]   ;;  %s2578_s1 = inlined_call_operand.vmem [shape: f32[16,32], index: 1, kind: input, shape index: {}]   ;;  %s2579_s2 = inlined_call_operand.vmem [shape: f32[32,192], index: 2, kind: input, shape index: {}]   ;;  %s2580_s3 = inlined_call_operand.vmem [shape: f32[1,192], index: 3, kind: input, shape index: {}]   ;;  %s2581_s4 = inlined_call_operand.vmem [shape: f32[32,96], index: 4, kind: input, shape index: {}]   ;;  %s2582_s5 = inlined_call_operand.vmem [shape: f32[1,96], index: 5, kind: input, shape index: {}]   ;;  %s2583_s6 = inlined_call_operand.vmem [shape: f32[32,96], index: 6, kind: input, shape index: {}]   ;;  %s2584_s7 = inlined_call_operand.vmem [shape: f32[1,96], index: 7, kind: input, shape index: {}]   ;;  %s2585_s8 = inlined_call_operand.vmem [shape: f32[128,64], index: 8, kind: input, shape index: {}]   ;;  %s2586_s9 = inlined_call_operand.vmem [shape: f32[1,64], index: 9, kind: input, shape index: {}]   ;;  %s2587_s10 = inlined_call_operand.vmem [shape: f32[64,32], index: 10, kind: input, shape index: {}]   ;;  %s2588_s11 = inlined_call_operand.vmem [shape: f32[1,32], index: 11, kind: input, shape index: {}]   ;;  %s2589_s12 = inlined_call_operand.hbm [shape: f32[2,16], index: 12, kind: output, shape index: {0}]   ;;  %s2590_s13 = inlined_call_operand.hbm [shape: f32[2,16], index: 13, kind: output, shape index: {1}]  }
   0x1   :  { %v65_v0 = vld [vmem:[%s2579_s2 + $0x30] sm:$0xff]  ;;  %v1993_v1 = vld [vmem:[%s2583_s6 + $0x18] sm:$0xff]  ;;  %v63_v2 = vld [vmem:[%s2579_s2 + $0x20] sm:$0xff] }
   0x2   :  { %92 = vmatpush.msra.mxu2 %v65_v0  ;;  %213 = vmatpush.msra.mxu3 %v1993_v1  ;;  %v2002_v3 = vld [vmem:[%s2583_s6 + $0x10] sm:$0xff]  ;;  %v2010_v5 = vld [vmem:[%s2583_s6 + $0x8] sm:$0xff]  ;;  %v2016_v6 = vld [vmem:[%s2581_s4 + $0x18] sm:$0xff] }
   0x3   :  { %v61_v4 = vld [vmem:[%s2579_s2 + $0x10] sm:$0xff]  ;;  %v59_v7 = vld [vmem:[%s2579_s2] sm:$0xff]  ;;  %845 = vmatpush.msra.mxu0 %v2016_v6 }
   0x4   :  { %93 = vmatpush.msra.mxu2 %v63_v2  ;;  %214 = vmatpush.msra.mxu3 %v2002_v3  ;;  %v2024_v8 = vld [vmem:[%s2583_s6] sm:$0xff]  ;;  %v2034_v10 = vld [vmem:[%s2581_s4 + $0x10] sm:$0xff] }
   0x5   :  { %v45_v9 = vld [vmem:[%s2577_s0] sm:$0xff]  ;;  %846 = vmatpush.msra.mxu0 %v2034_v10 }
   0x6   :  { %94 = vmatpush.msra.mxu2 %v61_v4  ;;  %215 = vmatpush.msra.mxu3 %v2010_v5 }
   0x7   :  { %20 = vsyncpa [#allocation5], 0  ;;  %v1910_v11 = vmov 0.0   ;;  %v2043_v12 = vld [vmem:[%s2581_s4 + $0x8] sm:$0xff]  ;;  %v2051_v13 = vld [vmem:[%s2581_s4] sm:$0xff]  ;;  %s1911_s24 = smov 96  }
   0x8   :  { %95 = vmatpush.msra.mxu2 %v59_v7  ;;  %216 = vmatpush.msra.mxu3 %v2024_v8  ;;  %v46_v14 = vld [vmem:[%s2577_s0 + $0x8] sm:$0xff]  ;;  %v2082_v15 = vld [vmem:[%s2584_s7] ss:$0 sm:$0xff]  ;;  %v66_v18 = vld [vmem:[%s2579_s2 + $0x38] sm:$0xff]  ;;  %s1912_s25 = smov 32   ;;  %s1914_s22 = smov [#allocation2]  }
   0x9   :  { %1668 = vmatmul.msk.f32.vlgmr.msra.gmra.mxu2 %vm73_vm0, %v45_v9  ;;  %217 = vmatmul.f32.vlgmr.msra.gmra.mxu3 %v1910_v11  ;;  %v64_v19 = vld [vmem:[%s2579_s2 + $0x28] sm:$0xff]  ;;  %v62_v22 = vld [vmem:[%s2579_s2 + $0x18] sm:$0xff]  ;;  %v2105_v25 = vld [vmem:[%s2582_s5] ss:$0 sm:$0xff]  ;;  %s1641_s23 = sshll.u32 %s1914_s22, 4  ;;  %s1642_s23 = int_to_ptr.vmem [resolvable:$true] %s1641_s23 }
   0xa   :  { %144 = vmatpush.msrb.mxu2 %v2016_v6  ;;  %385 = vmatpush.msrb.mxu3 %v1993_v1  ;;  %v60_v23 = vld [vmem:[%s2579_s2 + $0x8] sm:$0xff]  ;;  %s1913_s2 = smov 64   ;;  %v67_v28 = vld [vmem:[%s2580_s3] sm:$0x3] }
   0xb   :  { %847 = vmatpush.msra.mxu0 %v2043_v12  ;;  %115 = vmatpush.msra.mxu1 %v66_v18  ;;  %v69_v29 = vperm.slane %v67_v28, 0  ;;  %v70_v52 = vperm.slane %v67_v28, 1 }
   0xc   :  { %145 = vmatpush.msrb.mxu2 %v2034_v10  ;;  %386 = vmatpush.msrb.mxu3 %v2002_v3 }
   0xd   :  { %848 = vmatpush.msra.mxu0 %v2051_v13  ;;  %116 = vmatpush.msra.mxu1 %v64_v19 }
   0xe   :  { %146 = vmatpush.msrb.mxu2 %v2043_v12  ;;  %387 = vmatpush.msrb.mxu3 %v2010_v5 }
   0xf   :  { %1188 = vmatpush.msrb.mxu0 %v2016_v6  ;;  %117 = vmatpush.msra.mxu1 %v62_v22 }
  0x10   :  { %147 = vmatpush.msrb.mxu2 %v2051_v13  ;;  %388 = vmatpush.msrb.mxu3 %v2024_v8 }
  0x11   :  { %1669 = vmatmul.msk.f32.gmra.mxu2 %vm73_vm0, %v46_v14  ;;  %1189 = vmatpush.msrb.mxu0 %v2034_v10 }
  0x12   :  { %485 = vmatpush.msra.mxu3 %v2016_v6  ;;  %302 = vmatpush.msra.mxu2 %v2016_v6 }
  0x13   :  { %1190 = vmatpush.msrb.mxu0 %v2043_v12  ;;  %118 = vmatpush.msra.mxu1 %v60_v23 }
  0x14   :  { %486 = vmatpush.msra.mxu3 %v2034_v10  ;;  %303 = vmatpush.msra.mxu2 %v2034_v10 }
  0x15   :  { %1191 = vmatpush.msrb.mxu0 %v2051_v13  ;;  %1670 = vmatmul.msk.f32.vlgmr.msra.gmra.mxu1 %vm73_vm0, %v45_v9 }
  0x16   :  { %487 = vmatpush.msra.mxu3 %v2043_v12  ;;  %304 = vmatpush.msra.mxu2 %v2043_v12 }
  0x17   :  { %567 = vmatpush.msrb.mxu1 %v1993_v1 }
  0x18   :  { %488 = vmatpush.msra.mxu3 %v2051_v13  ;;  %305 = vmatpush.msra.mxu2 %v2051_v13 }
  0x19   :  { %148 = vmatmul.f32.vlgmr.msrb.gmra.mxu2 %v1910_v11  ;;  %568 = vmatpush.msrb.mxu1 %v2002_v3 }
  0x1a   :  { %666 = vmatpush.msrb.mxu2 %v2016_v6 }
  0x1b   :  { %569 = vmatpush.msrb.mxu1 %v2010_v5 }
  0x1c   :  { %667 = vmatpush.msrb.mxu2 %v2034_v10 }
  0x1d   :  { %570 = vmatpush.msrb.mxu1 %v2024_v8 }
  0x1e   :  { %668 = vmatpush.msrb.mxu2 %v2043_v12  ;;  %1671 = vmatmul.msk.f32.gmra.mxu1 %vm73_vm0, %v46_v14 }
  0x1f   :  { %919 = vmatpush.msra.mxu1 %v1993_v1 }
  0x20   :  { %669 = vmatpush.msrb.mxu2 %v2051_v13 }
  0x21   :  { %920 = vmatpush.msra.mxu1 %v2002_v3 }
  0x23   :  { %921 = vmatpush.msra.mxu1 %v2010_v5 }
  0x25   :  { %922 = vmatpush.msra.mxu1 %v2024_v8 }
  0x8c   :  { %v97_v16 = vpop.f32.mrf.mxu2  ;;  %v218_v17 = vpop.f32.mrf.mxu3 }
  0x8d   :  { %v219_v20 = vadd.f32 %v2082_v15, %v218_v17  ;;  %v2119_v30 = vadd.f32 %v97_v16, %v69_v29 }
  0x8f   :  { %v222_v21 = vrot.slane %v219_v20, 2 }
  0x91   :  { %223 = vrot.lane.b32.xlu1 %v222_v21, %s1911_s24  ;;  %266 = vrot.lane.b32.xlu2 %v222_v21, %s1912_s25 }
  0x92   :  { %v120_v54 = vpop.f32.mrf.mxu1 }
  0x93   :  { %v2125_v55 = vadd.f32 %v120_v54, %v70_v52 }
  0x94   :  { %v100_v24 = vpop.f32.mrf.mxu2 }
  0x95   :  { %v2122_v37 = vadd.f32 %v100_v24, %v69_v29 }
  0x9b   :  { %v123_v9 = vpop.f32.mrf.mxu1 }
  0x9c   :  { %v149_v26 = vpop.f32.mrf.mxu2  ;;  %v2130_v16 = vadd.f32 %v123_v9, %v70_v52 }
  0x9d   :  { %v150_v27 = vadd.f32 %v2105_v25, %v149_v26 }
  0x9f   :  { %173 = vrot.lane.b32.xlu0 %v150_v27, %s1913_s2  ;;  %v152_v31 = vadd.f32 %v150_v27, %v2119_v30 }
  0xa1   :  { %v1672_v32 = vmul.f32 -1.442695, %v152_v31 }
  0xa3   :  { %1722 = vpow2.f32 %v1672_v32 }
  0xa9   :  { %v1723_v33 = vpop.eup %1722 }
  0xaa   :  { %v156_v34 = vadd.f32 1.0, %v1723_v33 }
  0xac   :  { %1724 = vrcp.f32 %v156_v34  ;;  %v168_v44 = vand.u32 2147483648, %v156_v34  ;;  %vm162_vm2 = vweird.f32 %v156_v34  ;;  %v166_v45 = vand.u32 2147483647, %v156_v34 }
  0xae   :  { %v169_v49 = vor.u32 1.1754944e-38, %v168_v44  ;;  %vm167_vm4 = vcmp.eq.f32.partialorder %v166_v45, 8.507059e+37 }
  0xb2   :  { %v1725_v35 = vpop.eup %1724 }
  0xb3   :  { %v158_v36 = vmul.f32 %v1725_v35, %v156_v34  ;;  %vm163_vm1 = vweird.f32 %v1725_v35 }
  0xb4   :  { %vm164_vm3 = vmor %vm162_vm2, %vm163_vm1 }
  0xb5   :  { %v159_v38 = vsub.f32 1.0, %v158_v36 }
  0xb7   :  { %v160_v42 = vmul.f32 %v1725_v35, %v159_v38 }
  0xb9   :  { %v161_v43 = vadd.f32 %v1725_v35, %v160_v42 }
  0xbb   :  { %v165_v47 = vsel %vm164_vm3, %v1725_v35, %v161_v43 }
  0xbc   :  { %v170_v51 = vsel %vm167_vm4, %v169_v49, %v165_v47  ;;  %v2140_v47 = vld [vmem:[%s2578_s1 + $0x8] sm:$0xff] }
  0xbd   :  { %v183_v35 = vsub.f32 1.0, %v170_v51 }
  0xeb   :  { %v267_v63 = vpop.permute.xlu2 %266 }
 0x103   :  { %v224_v39 = vpop.permute.xlu1 %223 }
 0x104   :  { %v226_v40 = vadd.f32 %v224_v39, %v2122_v37  ;;  %v227_v21 = vadd.f32 %v224_v39, %v2130_v16  ;;  %v189_v39 = vmul.f32 0.0, %v170_v51 }
 0x106   :  { %v1673_v41 = vmul.f32 -1.442695, %v226_v40  ;;  %v1674_v22 = vmul.f32 -1.442695, %v227_v21 }
 0x108   :  { %1726 = vpow2.f32 %v1673_v41 }
 0x10e   :  { %v1727_v46 = vpop.eup %1726 }
 0x10f   :  { %v231_v48 = vadd.f32 1.0, %v1727_v46 }
 0x111   :  { %1728 = vrcp.f32 %v231_v48  ;;  %v174_v50 = vpop.permute.xlu0 %173  ;;  %v243_v59 = vand.u32 2147483648, %v231_v48  ;;  %v241_v61 = vand.u32 2147483647, %v231_v48  ;;  %vm237_vm6 = vweird.f32 %v231_v48 }
 0x112   :  { %v176_v53 = vmul.f32 %v174_v50, %v170_v51  ;;  %v2154_v51 = vld [vmem:[%s2578_s1] sm:$0xff] }
 0x113   :  { %v244_v0 = vor.u32 1.1754944e-38, %v243_v59  ;;  %vm242_vm8 = vcmp.eq.f32.partialorder %v241_v61, 8.507059e+37 }
 0x114   :  { %178 = vrot.lane.b32.xlu0 %v176_v53, %s1913_s2 }
 0x117   :  { %v1729_v56 = vpop.eup %1728 }
 0x118   :  { %v233_v57 = vmul.f32 %v1729_v56, %v231_v48  ;;  %vm238_vm5 = vweird.f32 %v1729_v56 }
 0x119   :  { %vm239_vm7 = vmor %vm237_vm6, %vm238_vm5 }
 0x11a   :  { %v234_v58 = vsub.f32 1.0, %v233_v57 }
 0x11c   :  { %v235_v60 = vmul.f32 %v1729_v56, %v234_v58 }
 0x11e   :  { %v236_v62 = vadd.f32 %v1729_v56, %v235_v60 }
 0x120   :  { %v240_v2 = vsel %vm239_vm7, %v1729_v56, %v236_v62 }
 0x121   :  { %v245_v4 = vsel %vm242_vm8, %v244_v0, %v240_v2 }
 0x122   :  { %v269_v7 = vmul.f32 %v267_v63, %v245_v4 }
 0x124   :  { %271 = vrot.lane.b32.xlu2 %v269_v7, %s1913_s2 }
 0x17e   :  { %v272_v17 = vpop.permute.xlu2 %271 }
 0x17f   :  { %v274_v18 = vadd.f32 %v272_v17, %v2130_v16 }
 0x186   :  { %v179_v11 = vpop.permute.xlu0 %178 }
 0x187   :  { %v181_v14 = vadd.f32 %v179_v11, %v2119_v30 }
 0x189   :  { %1730 = vtanh.f32 %v181_v14 }
 0x18a   :  { %1732 = vtanh.f32 %v274_v18 }
 0x18b   :  { %1734 = vpow2.f32 %v1674_v22 }
 0x18f   :  { %v1731_v19 = vpop.eup %1730 }
 0x190   :  { %185 = vrot.lane.b32.xlu1 %v1731_v19, %s1911_s24  ;;  %v1733_v20 = vpop.eup %1732 }
 0x191   :  { %v1735_v23 = vpop.eup %1734 }
 0x192   :  { %v250_v24 = vadd.f32 1.0, %v1735_v23 }
 0x194   :  { %1736 = vrcp.f32 %v250_v24  ;;  %vm256_vm9 = vweird.f32 %v250_v24  ;;  %v262_v31 = vand.u32 2147483648, %v250_v24  ;;  %v260_v33 = vand.u32 2147483647, %v250_v24 }
 0x196   :  { %v263_v34 = vor.u32 1.1754944e-38, %v262_v31  ;;  %vm261_vm12 = vcmp.eq.f32.partialorder %v260_v33, 8.507059e+37 }
 0x198   :  { %278 = vrot.lane.b32.xlu1 %v1733_v20, %s1911_s24 }
 0x19a   :  { %v1737_v26 = vpop.eup %1736 }
 0x19b   :  { %v252_v27 = vmul.f32 %v1737_v26, %v250_v24  ;;  %vm257_vm10 = vweird.f32 %v1737_v26 }
 0x19c   :  { %vm258_vm11 = vmor %vm256_vm9, %vm257_vm10 }
 0x19d   :  { %v253_v28 = vsub.f32 1.0, %v252_v27 }
 0x19f   :  { %v254_v29 = vmul.f32 %v1737_v26, %v253_v28 }
 0x1a1   :  { %v255_v32 = vadd.f32 %v1737_v26, %v254_v29 }
 0x1a3   :  { %v259_v36 = vsel %vm258_vm11, %v1737_v26, %v255_v32 }
 0x1a4   :  { %v264_v41 = vsel %vm261_vm12, %v263_v34, %v259_v36 }
 0x1a5   :  { %v276_v43 = vsub.f32 1.0, %v264_v41  ;;  %v282_v44 = vmul.f32 0.0, %v264_v41 }
 0x202   :  { %v186_v38 = vpop.permute.xlu1 %185 }
 0x203   :  { %v188_v40 = vmul.f32 %v186_v38, %v183_v35 }
 0x205   :  { %v190_v42 = vadd.f32 %v189_v39, %v188_v40 }
 0x207   :  { %192 = vrot.lane.b32.xlu0 %v190_v42, %s1911_s24 }
 0x20a   :  { %v279_v45 = vpop.permute.xlu1 %278 }
 0x20b   :  { %v281_v46 = vmul.f32 %v279_v45, %v276_v43 }
 0x20d   :  { %v283_v48 = vadd.f32 %v282_v44, %v281_v46 }
 0x20f   :  { %v2143_v49 = vmul.f32 %v283_v48, %v2140_v47 }
 0x211   :  { %v370_v50 = vrot.slane %v2143_v49, 6 }
 0x213   :  { %1677 = vmatmul.msk.f32.vlgmr.msrb.gmra.mxu3 %vm73_vm0, %v370_v50 }
 0x214   :  { %748 = vmatpush.msrb.mxu3 %v1993_v1 }
 0x216   :  { %749 = vmatpush.msrb.mxu3 %v2002_v3 }
 0x218   :  { %750 = vmatpush.msrb.mxu3 %v2010_v5 }
 0x21a   :  { %751 = vmatpush.msrb.mxu3 %v2024_v8 }
 0x279   :  { %v193_v52 = vpop.permute.xlu0 %192 }
 0x27a   :  { %v2157_v53 = vmul.f32 %v193_v52, %v2154_v51 }
 0x27c   :  { %1675 = vmatmul.msk.f32.vlgmr.msra.gmra.mxu2 %vm73_vm0, %v2157_v53  ;;  %v349_v58 = vrot.slane %v2157_v53, 6 }
 0x27d   :  { %1011 = vmatpush.msra.mxu2 %v2016_v6 }
 0x27f   :  { %1012 = vmatpush.msra.mxu2 %v2034_v10 }
 0x281   :  { %1013 = vmatpush.msra.mxu2 %v2043_v12 }
 0x283   :  { %1014 = vmatpush.msra.mxu2 %v2051_v13 }
 0x296   :  { %v390_v54 = vpop.f32.mrf.mxu3 }
 0x297   :  { %v391_v56 = vadd.f32 %v2082_v15, %v390_v54 }
 0x299   :  { %v394_v57 = vrot.slane %v391_v56, 4 }
 0x29b   :  { %395 = vrot.lane.b32.xlu1 %v394_v57, %s1911_s24 }
 0x2a3   :  { %350 = vrot.lane.b32.xlu1 %v349_v58, %s1912_s25 }
 0x2ff   :  { %v307_v59 = vpop.f32.mrf.mxu2 }
 0x300   :  { %v308_v60 = vadd.f32 %v2105_v25, %v307_v59 }
 0x302   :  { %v311_v61 = vrot.slane %v308_v60, 6 }
 0x304   :  { %333 = vrot.lane.b32.xlu2 %v311_v61, %s1913_s2  ;;  %v313_v62 = vadd.f32 %v311_v61, %v2119_v30 }
 0x306   :  { %v1676_v63 = vmul.f32 -1.442695, %v313_v62 }
 0x308   :  { %1738 = vpow2.f32 %v1676_v63 }
 0x30c   :  { %438 = vrot.lane.b32.xlu2 %v394_v57, %s1912_s25 }
 0x30d   :  { %v396_v0 = vpop.permute.xlu1 %395 }
 0x30e   :  { %v398_v2 = vadd.f32 %v396_v0, %v2122_v37  ;;  %v1739_v7 = vpop.eup %1738  ;;  %v399_v54 = vadd.f32 %v396_v0, %v2130_v16 }
 0x30f   :  { %v317_v9 = vadd.f32 1.0, %v1739_v7 }
 0x310   :  { %v1678_v4 = vmul.f32 -1.442695, %v398_v2  ;;  %v1679_v56 = vmul.f32 -1.442695, %v399_v54 }
 0x311   :  { %v329_v26 = vand.u32 2147483648, %v317_v9  ;;  %vm323_vm14 = vweird.f32 %v317_v9  ;;  %v327_v27 = vand.u32 2147483647, %v317_v9 }
 0x312   :  { %1740 = vpow2.f32 %v1678_v4 }
 0x313   :  { %1742 = vrcp.f32 %v317_v9  ;;  %v330_v31 = vor.u32 1.1754944e-38, %v329_v26  ;;  %vm328_vm1 = vcmp.eq.f32.partialorder %v327_v27, 8.507059e+37 }
 0x315   :  { %v351_v7 = vpop.permute.xlu1 %350 }
 0x318   :  { %v1741_v11 = vpop.eup %1740 }
 0x319   :  { %v403_v14 = vadd.f32 1.0, %v1741_v11  ;;  %v1743_v17 = vpop.eup %1742 }
 0x31a   :  { %v319_v18 = vmul.f32 %v1743_v17, %v317_v9  ;;  %vm324_vm13 = vweird.f32 %v1743_v17 }
 0x31b   :  { %1744 = vrcp.f32 %v403_v14  ;;  %vm325_vm15 = vmor %vm323_vm14, %vm324_vm13  ;;  %v415_v36 = vand.u32 2147483648, %v403_v14  ;;  %vm409_vm3 = vweird.f32 %v403_v14  ;;  %v413_v38 = vand.u32 2147483647, %v403_v14 }
 0x31c   :  { %v320_v19 = vsub.f32 1.0, %v319_v18 }
 0x31d   :  { %v416_v40 = vor.u32 1.1754944e-38, %v415_v36  ;;  %vm414_vm5 = vcmp.eq.f32.partialorder %v413_v38, 8.507059e+37 }
 0x31e   :  { %v321_v21 = vmul.f32 %v1743_v17, %v320_v19 }
 0x320   :  { %v322_v23 = vadd.f32 %v1743_v17, %v321_v21 }
 0x321   :  { %v1745_v20 = vpop.eup %1744 }
 0x322   :  { %v405_v22 = vmul.f32 %v1745_v20, %v403_v14  ;;  %v326_v28 = vsel %vm325_vm15, %v1743_v17, %v322_v23  ;;  %vm410_vm2 = vweird.f32 %v1745_v20  ;;  %v454_v17 = vrot.slane %v2143_v49, 2 }
 0x323   :  { %v2174_v32 = vsel %vm328_vm1, %v330_v31, %v326_v28  ;;  %vm411_vm4 = vmor %vm409_vm3, %vm410_vm2 }
 0x324   :  { %v406_v24 = vsub.f32 1.0, %v405_v22  ;;  %v343_v28 = vsub.f32 1.0, %v2174_v32  ;;  %v353_v31 = vmul.f32 %v351_v7, %v2174_v32 }
 0x326   :  { %v407_v29 = vmul.f32 %v1745_v20, %v406_v24 }
 0x328   :  { %v408_v35 = vadd.f32 %v1745_v20, %v407_v29 }
 0x32a   :  { %v412_v39 = vsel %vm411_vm4, %v1745_v20, %v408_v35 }
 0x32b   :  { %v417_v42 = vsel %vm414_vm5, %v416_v40, %v412_v39 }
 0x35e   :  { %v334_v33 = vpop.permute.xlu2 %333 }
 0x35f   :  { %v336_v34 = vmul.f32 %v334_v33, %v2174_v32 }
 0x361   :  { %338 = vrot.lane.b32.xlu0 %v336_v34, %s1913_s2 }
 0x366   :  { %v439_v41 = vpop.permute.xlu2 %438 }
 0x367   :  { %v441_v43 = vmul.f32 %v439_v41, %v417_v42 }
 0x369   :  { %443 = vrot.lane.b32.xlu2 %v441_v43, %s1913_s2 }
 0x3c3   :  { %v444_v44 = vpop.permute.xlu2 %443 }
 0x3c4   :  { %v446_v45 = vadd.f32 %v444_v44, %v2130_v16 }
 0x3c6   :  { %1746 = vtanh.f32 %v446_v45 }
 0x3cc   :  { %v1747_v46 = vpop.eup %1746 }
 0x3cd   :  { %450 = vrot.lane.b32.xlu1 %v1747_v46, %s1911_s24 }
 0x3d3   :  { %v339_v48 = vpop.permute.xlu0 %338 }
 0x3d4   :  { %v341_v50 = vadd.f32 %v339_v48, %v2119_v30 }
 0x3d6   :  { %1748 = vtanh.f32 %v341_v50 }
 0x3d7   :  { %1750 = vpow2.f32 %v1679_v56 }
 0x3dc   :  { %v1749_v52 = vpop.eup %1748 }
 0x3dd   :  { %345 = vrot.lane.b32.xlu0 %v1749_v52, %s1911_s24  ;;  %v1751_v57 = vpop.eup %1750 }
 0x3de   :  { %v422_v58 = vadd.f32 1.0, %v1751_v57 }
 0x3e0   :  { %1752 = vrcp.f32 %v422_v58  ;;  %v434_v2 = vand.u32 2147483648, %v422_v58  ;;  %vm428_vm7 = vweird.f32 %v422_v58  ;;  %v432_v4 = vand.u32 2147483647, %v422_v58 }
 0x3e2   :  { %v435_v11 = vor.u32 1.1754944e-38, %v434_v2  ;;  %vm433_vm9 = vcmp.eq.f32.partialorder %v432_v4, 8.507059e+37 }
 0x3e6   :  { %v1753_v59 = vpop.eup %1752 }
 0x3e7   :  { %v424_v60 = vmul.f32 %v1753_v59, %v422_v58  ;;  %vm429_vm6 = vweird.f32 %v1753_v59 }
 0x3e8   :  { %vm430_vm8 = vmor %vm428_vm7, %vm429_vm6 }
 0x3e9   :  { %v425_v61 = vsub.f32 1.0, %v424_v60 }
 0x3eb   :  { %v426_v62 = vmul.f32 %v1753_v59, %v425_v61 }
 0x3ed   :  { %v427_v63 = vadd.f32 %v1753_v59, %v426_v62 }
 0x3ef   :  { %v431_v9 = vsel %vm430_vm8, %v1753_v59, %v427_v63 }
 0x3f0   :  { %v436_v0 = vsel %vm433_vm9, %v435_v11, %v431_v9 }
 0x3f1   :  { %v448_v14 = vsub.f32 1.0, %v436_v0  ;;  %v456_v19 = vmul.f32 %v454_v17, %v436_v0 }
 0x43f   :  { %v451_v18 = vpop.permute.xlu1 %450 }
 0x440   :  { %v453_v20 = vmul.f32 %v451_v18, %v448_v14 }
 0x442   :  { %v457_v21 = vadd.f32 %v456_v19, %v453_v20 }
 0x444   :  { %v458_v22 = vsub.f32 %v457_v21, %v454_v17 }
 0x446   :  { %v459_v23 = vmul.f32 %v458_v22, %v2140_v47 }
 0x448   :  { %v461_v24 = vrot.slane %v459_v23, 6 }
 0x44a   :  { %v2187_v26 = vadd.f32 %v461_v24, %v2143_v49 }
 0x44c   :  { %v552_v27 = vrot.slane %v2187_v26, 6 }
 0x44e   :  { %1682 = vmatmul.msk.f32.vlgmr.msrb.gmra.mxu1 %vm73_vm0, %v552_v27 }
 0x44f   :  { %v346_v29 = vpop.permute.xlu0 %345  ;;  %1268 = vmatpush.msrb.mxu1 %v1993_v1 }
 0x450   :  { %v348_v33 = vmul.f32 %v346_v29, %v343_v28 }
 0x451   :  { %1269 = vmatpush.msrb.mxu1 %v2002_v3 }
 0x452   :  { %v354_v34 = vadd.f32 %v353_v31, %v348_v33 }
 0x453   :  { %1270 = vmatpush.msrb.mxu1 %v2010_v5 }
 0x454   :  { %v355_v35 = vsub.f32 %v354_v34, %v351_v7 }
 0x455   :  { %1271 = vmatpush.msrb.mxu1 %v2024_v8 }
 0x456   :  { %357 = vrot.lane.b32.xlu0 %v355_v35, %s1911_s24 }
 0x4c8   :  { %v358_v36 = vpop.permute.xlu0 %357 }
 0x4c9   :  { %v360_v38 = vmul.f32 %v358_v36, %v2154_v51 }
 0x4cb   :  { %v362_v39 = vrot.slane %v360_v38, 2  ;;  %v572_v40 = vpop.f32.mrf.mxu1 }
 0x4cc   :  { %v573_v41 = vadd.f32 %v2082_v15, %v572_v40 }
 0x4cd   :  { %v2201_v32 = vadd.f32 %v362_v39, %v2157_v53 }
 0x4ce   :  { %v576_v42 = vrot.slane %v573_v41, 6 }
 0x4cf   :  { %1680 = vmatmul.msk.f32.vlgmr.msra.gmra.mxu3 %vm73_vm0, %v2201_v32  ;;  %v532_v34 = vrot.slane %v2201_v32, 4 }
 0x4d0   :  { %577 = vrot.lane.b32.xlu0 %v576_v42, %s1911_s24  ;;  %1091 = vmatpush.msra.mxu3 %v1993_v1 }
 0x4d2   :  { %1092 = vmatpush.msra.mxu3 %v2002_v3 }
 0x4d4   :  { %1093 = vmatpush.msra.mxu3 %v2010_v5 }
 0x4d6   :  { %1094 = vmatpush.msra.mxu3 %v2024_v8 }
 0x542   :  { %v578_v50 = vpop.permute.xlu0 %577 }
 0x543   :  { %v580_v52 = vadd.f32 %v578_v50, %v2122_v37 }
 0x545   :  { %v1683_v54 = vmul.f32 -1.442695, %v580_v52 }
 0x552   :  { %v490_v43 = vpop.f32.mrf.mxu3 }
 0x553   :  { %v491_v44 = vadd.f32 %v2105_v25, %v490_v43 }
 0x555   :  { %v494_v45 = vrot.slane %v491_v44, 4 }
 0x557   :  { %516 = vrot.lane.b32.xlu2 %v494_v45, %s1913_s2  ;;  %v496_v46 = vadd.f32 %v494_v45, %v2119_v30 }
 0x559   :  { %v1681_v48 = vmul.f32 -1.442695, %v496_v46 }
 0x55b   :  { %1754 = vpow2.f32 %v1681_v48 }
 0x55c   :  { %1756 = vpow2.f32 %v1683_v54 }
 0x55f   :  { %620 = vrot.lane.b32.xlu2 %v576_v42, %s1912_s25  ;;  %v581_v42 = vadd.f32 %v578_v50, %v2130_v16 }
 0x561   :  { %v1755_v56 = vpop.eup %1754  ;;  %v1684_v43 = vmul.f32 -1.442695, %v581_v42 }
 0x562   :  { %v500_v57 = vadd.f32 1.0, %v1755_v56  ;;  %v1757_v58 = vpop.eup %1756 }
 0x563   :  { %v585_v59 = vadd.f32 1.0, %v1757_v58 }
 0x564   :  { %1758 = vrcp.f32 %v500_v57  ;;  %v512_v11 = vand.u32 2147483648, %v500_v57  ;;  %vm506_vm11 = vweird.f32 %v500_v57  ;;  %v510_v0 = vand.u32 2147483647, %v500_v57 }
 0x565   :  { %1760 = vrcp.f32 %v585_v59  ;;  %v597_v23 = vand.u32 2147483648, %v585_v59  ;;  %vm591_vm15 = vweird.f32 %v585_v59  ;;  %v595_v24 = vand.u32 2147483647, %v585_v59 }
 0x566   :  { %v513_v18 = vor.u32 1.1754944e-38, %v512_v11  ;;  %vm511_vm13 = vcmp.eq.f32.partialorder %v510_v0, 8.507059e+37 }
 0x567   :  { %v598_v28 = vor.u32 1.1754944e-38, %v597_v23  ;;  %vm596_vm2 = vcmp.eq.f32.partialorder %v595_v24, 8.507059e+37 }
 0x56a   :  { %v1759_v60 = vpop.eup %1758 }
 0x56b   :  { %v502_v61 = vmul.f32 %v1759_v60, %v500_v57  ;;  %v1761_v63 = vpop.eup %1760  ;;  %vm507_vm10 = vweird.f32 %v1759_v60 }
 0x56c   :  { %v587_v4 = vmul.f32 %v1761_v63, %v585_v59  ;;  %vm508_vm12 = vmor %vm506_vm11, %vm507_vm10  ;;  %vm592_vm14 = vweird.f32 %v1761_v63 }
 0x56d   :  { %v503_v62 = vsub.f32 1.0, %v502_v61  ;;  %vm593_vm1 = vmor %vm591_vm15, %vm592_vm14 }
 0x56e   :  { %v588_v9 = vsub.f32 1.0, %v587_v4 }
 0x56f   :  { %v504_v2 = vmul.f32 %v1759_v60, %v503_v62 }
 0x570   :  { %v589_v17 = vmul.f32 %v1761_v63, %v588_v9 }
 0x571   :  { %v505_v7 = vadd.f32 %v1759_v60, %v504_v2 }
 0x572   :  { %v590_v22 = vadd.f32 %v1761_v63, %v589_v17 }
 0x573   :  { %v509_v14 = vsel %vm508_vm12, %v1759_v60, %v505_v7 }
 0x574   :  { %v2215_v20 = vsel %vm511_vm13, %v513_v18, %v509_v14  ;;  %v594_v27 = vsel %vm593_vm1, %v1761_v63, %v590_v22  ;;  %v636_v63 = vrot.slane %v2187_v26, 4 }
 0x575   :  { %v599_v31 = vsel %vm596_vm2, %v598_v28, %v594_v27 }
 0x5b1   :  { %v517_v19 = vpop.permute.xlu2 %516 }
 0x5b2   :  { %v519_v21 = vmul.f32 %v517_v19, %v2215_v20  ;;  %v526_v19 = vsub.f32 1.0, %v2215_v20 }
 0x5b4   :  { %521 = vrot.lane.b32.xlu1 %v519_v21, %s1913_s2 }
 0x5b9   :  { %v621_v29 = vpop.permute.xlu2 %620 }
 0x5ba   :  { %v623_v33 = vmul.f32 %v621_v29, %v599_v31 }
 0x5bc   :  { %533 = vrot.lane.b32.xlu1 %v532_v34, %s1912_s25  ;;  %625 = vrot.lane.b32.xlu2 %v623_v33, %s1913_s2 }
 0x616   :  { %v626_v35 = vpop.permute.xlu2 %625 }
 0x617   :  { %v628_v36 = vadd.f32 %v626_v35, %v2130_v16 }
 0x619   :  { %1762 = vtanh.f32 %v628_v36 }
 0x61f   :  { %v1763_v38 = vpop.eup %1762 }
 0x620   :  { %632 = vrot.lane.b32.xlu1 %v1763_v38, %s1911_s24 }
 0x626   :  { %v522_v39 = vpop.permute.xlu1 %521 }
 0x627   :  { %v524_v40 = vadd.f32 %v522_v39, %v2119_v30 }
 0x629   :  { %1764 = vtanh.f32 %v524_v40 }
 0x62a   :  { %1766 = vpow2.f32 %v1684_v43 }
 0x62e   :  { %v534_v59 = vpop.permute.xlu1 %533 }
 0x62f   :  { %v1765_v41 = vpop.eup %1764  ;;  %v536_v22 = vmul.f32 %v534_v59, %v2215_v20 }
 0x630   :  { %528 = vrot.lane.b32.xlu0 %v1765_v41, %s1911_s24  ;;  %v1767_v44 = vpop.eup %1766 }
 0x631   :  { %v604_v45 = vadd.f32 1.0, %v1767_v44 }
 0x633   :  { %1768 = vrcp.f32 %v604_v45  ;;  %v616_v57 = vand.u32 2147483648, %v604_v45  ;;  %vm610_vm4 = vweird.f32 %v604_v45  ;;  %v614_v58 = vand.u32 2147483647, %v604_v45 }
 0x635   :  { %v617_v61 = vor.u32 1.1754944e-38, %v616_v57  ;;  %vm615_vm6 = vcmp.eq.f32.partialorder %v614_v58, 8.507059e+37 }
 0x639   :  { %v1769_v46 = vpop.eup %1768 }
 0x63a   :  { %v606_v48 = vmul.f32 %v1769_v46, %v604_v45  ;;  %vm611_vm3 = vweird.f32 %v1769_v46 }
 0x63b   :  { %vm612_vm5 = vmor %vm610_vm4, %vm611_vm3 }
 0x63c   :  { %v607_v52 = vsub.f32 1.0, %v606_v48 }
 0x63e   :  { %v608_v54 = vmul.f32 %v1769_v46, %v607_v52 }
 0x640   :  { %v609_v56 = vadd.f32 %v1769_v46, %v608_v54 }
 0x642   :  { %v613_v60 = vsel %vm612_vm5, %v1769_v46, %v609_v56 }
 0x643   :  { %v618_v50 = vsel %vm615_vm6, %v617_v61, %v613_v60 }
 0x644   :  { %v630_v62 = vsub.f32 1.0, %v618_v50  ;;  %v638_v4 = vmul.f32 %v636_v63, %v618_v50 }
 0x692   :  { %v633_v2 = vpop.permute.xlu1 %632 }
 0x693   :  { %v635_v7 = vmul.f32 %v633_v2, %v630_v62 }
 0x695   :  { %v639_v9 = vadd.f32 %v638_v4, %v635_v7 }
 0x697   :  { %v640_v11 = vsub.f32 %v639_v9, %v636_v63 }
 0x699   :  { %v641_v0 = vmul.f32 %v640_v11, %v2140_v47 }
 0x69b   :  { %v643_v14 = vrot.slane %v641_v0, 4 }
 0x69d   :  { %v2230_v17 = vadd.f32 %v643_v14, %v2187_v26 }
 0x69f   :  { %v2233_v18 = vrot.slane %v2230_v17, 6 }
 0x6a1   :  { %1687 = vmatmul.msk.f32.vlgmr.msrb.gmra.mxu3 %vm73_vm0, %v2233_v18 }
 0x6a2   :  { %v529_v21 = vpop.permute.xlu0 %528  ;;  %1445 = vmatpush.msrb.mxu3 %v1993_v1 }
 0x6a3   :  { %v531_v23 = vmul.f32 %v529_v21, %v526_v19 }
 0x6a4   :  { %1446 = vmatpush.msrb.mxu3 %v2002_v3 }
 0x6a5   :  { %v537_v24 = vadd.f32 %v536_v22, %v531_v23 }
 0x6a6   :  { %1447 = vmatpush.msrb.mxu3 %v2010_v5 }
 0x6a7   :  { %v538_v27 = vsub.f32 %v537_v24, %v534_v59 }
 0x6a8   :  { %1448 = vmatpush.msrb.mxu3 %v2024_v8 }
 0x6a9   :  { %540 = vrot.lane.b32.xlu0 %v538_v27, %s1911_s24 }
 0x71b   :  { %v541_v28 = vpop.permute.xlu0 %540 }
 0x71c   :  { %v543_v29 = vmul.f32 %v541_v28, %v2154_v51 }
 0x71e   :  { %v545_v31 = vrot.slane %v543_v29, 4 }
 0x720   :  { %v2246_v33 = vadd.f32 %v545_v31, %v2201_v32 }
 0x722   :  { %1685 = vmatmul.msk.f32.vlgmr.msrb.gmra.mxu2 %vm73_vm0, %v2246_v33  ;;  %v713_v0 = vrot.slane %v2246_v33, 2 }
 0x723   :  { %1365 = vmatpush.msrb.mxu2 %v2016_v6 }
 0x724   :  { %v753_v1 = vpop.f32.mrf.mxu3 }
 0x725   :  { %v754_v3 = vadd.f32 %v2082_v15, %v753_v1  ;;  %1366 = vmatpush.msrb.mxu2 %v2034_v10 }
 0x727   :  { %757 = vrot.lane.b32.xlu0 %v754_v3, %s1911_s24  ;;  %1367 = vmatpush.msrb.mxu2 %v2043_v12 }
 0x729   :  { %1368 = vmatpush.msrb.mxu2 %v2051_v13 }
 0x799   :  { %v758_v35 = vpop.permute.xlu0 %757 }
 0x79a   :  { %v760_v10 = vadd.f32 %v758_v35, %v2122_v37  ;;  %v761_v27 = vadd.f32 %v758_v35, %v2130_v16 }
 0x79c   :  { %v1688_v36 = vmul.f32 -1.442695, %v760_v10  ;;  %v1689_v28 = vmul.f32 -1.442695, %v761_v27 }
 0x7a5   :  { %v671_v5 = vpop.f32.mrf.mxu2 }
 0x7a6   :  { %v672_v8 = vadd.f32 %v2105_v25, %v671_v5 }
 0x7a8   :  { %v675_v20 = vrot.slane %v672_v8, 2 }
 0x7aa   :  { %697 = vrot.lane.b32.xlu2 %v675_v20, %s1913_s2  ;;  %v677_v6 = vadd.f32 %v675_v20, %v2119_v30 }
 0x7ac   :  { %v1686_v34 = vmul.f32 -1.442695, %v677_v6 }
 0x7ae   :  { %1770 = vpow2.f32 %v1686_v34 }
 0x7af   :  { %1772 = vpow2.f32 %v1688_v36 }
 0x7b2   :  { %800 = vrot.lane.b32.xlu2 %v754_v3, %s1912_s25 }
 0x7b4   :  { %v1771_v38 = vpop.eup %1770 }
 0x7b5   :  { %v681_v12 = vadd.f32 1.0, %v1771_v38  ;;  %v1773_v13 = vpop.eup %1772 }
 0x7b6   :  { %v765_v39 = vadd.f32 1.0, %v1773_v13 }
 0x7b7   :  { %1774 = vrcp.f32 %v681_v12  ;;  %v693_v52 = vand.u32 2147483648, %v681_v12  ;;  %vm687_vm8 = vweird.f32 %v681_v12  ;;  %v691_v54 = vand.u32 2147483647, %v681_v12 }
 0x7b8   :  { %1776 = vrcp.f32 %v765_v39  ;;  %v777_v62 = vand.u32 2147483648, %v765_v39  ;;  %vm771_vm12 = vweird.f32 %v765_v39  ;;  %v775_v63 = vand.u32 2147483647, %v765_v39 }
 0x7b9   :  { %v694_v58 = vor.u32 1.1754944e-38, %v693_v52  ;;  %vm692_vm10 = vcmp.eq.f32.partialorder %v691_v54, 8.507059e+37 }
 0x7ba   :  { %v778_v4 = vor.u32 1.1754944e-38, %v777_v62  ;;  %vm776_vm14 = vcmp.eq.f32.partialorder %v775_v63, 8.507059e+37 }
 0x7bd   :  { %v1775_v40 = vpop.eup %1774 }
 0x7be   :  { %v683_v41 = vmul.f32 %v1775_v40, %v681_v12  ;;  %v1777_v43 = vpop.eup %1776  ;;  %vm688_vm7 = vweird.f32 %v1775_v40 }
 0x7bf   :  { %v767_v45 = vmul.f32 %v1777_v43, %v765_v39  ;;  %vm689_vm9 = vmor %vm687_vm8, %vm688_vm7  ;;  %vm772_vm11 = vweird.f32 %v1777_v43 }
 0x7c0   :  { %v684_v42 = vsub.f32 1.0, %v683_v41  ;;  %vm773_vm13 = vmor %vm771_vm12, %vm772_vm11 }
 0x7c1   :  { %v768_v48 = vsub.f32 1.0, %v767_v45 }
 0x7c2   :  { %v685_v44 = vmul.f32 %v1775_v40, %v684_v42 }
 0x7c3   :  { %v769_v57 = vmul.f32 %v1777_v43, %v768_v48 }
 0x7c4   :  { %v686_v46 = vadd.f32 %v1775_v40, %v685_v44 }
 0x7c5   :  { %v770_v50 = vadd.f32 %v1777_v43, %v769_v57 }
 0x7c6   :  { %v690_v56 = vsel %vm689_vm9, %v1775_v40, %v686_v46 }
 0x7c7   :  { %v2261_v60 = vsel %vm692_vm10, %v694_v58, %v690_v56  ;;  %v774_v2 = vsel %vm773_vm13, %v1777_v43, %v770_v50 }
 0x7c8   :  { %v779_v9 = vsel %vm776_vm14, %v778_v4, %v774_v2  ;;  %v707_v46 = vsub.f32 1.0, %v2261_v60 }
 0x804   :  { %v698_v59 = vpop.permute.xlu2 %697 }
 0x805   :  { %v700_v61 = vmul.f32 %v698_v59, %v2261_v60 }
 0x807   :  { %702 = vrot.lane.b32.xlu1 %v700_v61, %s1913_s2 }
 0x80c   :  { %v801_v7 = vpop.permute.xlu2 %800 }
 0x80d   :  { %v803_v11 = vmul.f32 %v801_v7, %v779_v9 }
 0x80f   :  { %714 = vrot.lane.b32.xlu1 %v713_v0, %s1912_s25  ;;  %805 = vrot.lane.b32.xlu2 %v803_v11, %s1913_s2 }
 0x869   :  { %v806_v14 = vpop.permute.xlu2 %805 }
 0x86a   :  { %v808_v19 = vadd.f32 %v806_v14, %v2130_v16 }
 0x86c   :  { %1778 = vtanh.f32 %v808_v19 }
 0x872   :  { %v1779_v21 = vpop.eup %1778 }
 0x873   :  { %812 = vrot.lane.b32.xlu1 %v1779_v21, %s1911_s24 }
 0x879   :  { %v703_v22 = vpop.permute.xlu1 %702 }
 0x87a   :  { %v705_v23 = vadd.f32 %v703_v22, %v2119_v30 }
 0x87c   :  { %1780 = vtanh.f32 %v705_v23 }
 0x87d   :  { %1782 = vpow2.f32 %v1689_v28 }
 0x881   :  { %v715_v10 = vpop.permute.xlu1 %714 }
 0x882   :  { %v1781_v24 = vpop.eup %1780  ;;  %v717_v52 = vmul.f32 %v715_v10, %v2261_v60 }
 0x883   :  { %709 = vrot.lane.b32.xlu0 %v1781_v24, %s1911_s24  ;;  %v1783_v29 = vpop.eup %1782 }
 0x884   :  { %v784_v31 = vadd.f32 1.0, %v1783_v29 }
 0x886   :  { %1784 = vrcp.f32 %v784_v31  ;;  %v796_v6 = vand.u32 2147483648, %v784_v31  ;;  %vm790_vm1 = vweird.f32 %v784_v31  ;;  %v794_v34 = vand.u32 2147483647, %v784_v31 }
 0x888   :  { %v797_v38 = vor.u32 1.1754944e-38, %v796_v6  ;;  %vm795_vm3 = vcmp.eq.f32.partialorder %v794_v34, 8.507059e+37 }
 0x88c   :  { %v1785_v1 = vpop.eup %1784 }
 0x88d   :  { %v786_v3 = vmul.f32 %v1785_v1, %v784_v31  ;;  %vm791_vm15 = vweird.f32 %v1785_v1 }
 0x88e   :  { %vm792_vm2 = vmor %vm790_vm1, %vm791_vm15 }
 0x88f   :  { %v787_v5 = vsub.f32 1.0, %v786_v3 }
 0x891   :  { %v788_v8 = vmul.f32 %v1785_v1, %v787_v5 }
 0x893   :  { %v789_v20 = vadd.f32 %v1785_v1, %v788_v8 }
 0x895   :  { %v793_v36 = vsel %vm792_vm2, %v1785_v1, %v789_v20 }
 0x896   :  { %v798_v16 = vsel %vm795_vm3, %v797_v38, %v793_v36 }
 0x897   :  { %v810_v35 = vsub.f32 1.0, %v798_v16  ;;  %v817_v13 = vmul.f32 %v798_v16, %v2233_v18 }
 0x8e5   :  { %v813_v12 = vpop.permute.xlu1 %812 }
 0x8e6   :  { %v815_v39 = vmul.f32 %v813_v12, %v810_v35 }
 0x8e8   :  { %v818_v40 = vadd.f32 %v817_v13, %v815_v39 }
 0x8ea   :  { %v819_v41 = vsub.f32 %v818_v40, %v2233_v18 }
 0x8ec   :  { %v820_v42 = vmul.f32 %v819_v41, %v2140_v47 }
 0x8ee   :  { %v822_v43 = vrot.slane %v820_v42, 2 }
 0x8f0   :  { %v2277_v44 = vadd.f32 %v822_v43, %v2230_v17 }
 0x8f2   :  { %v904_v45 = vrot.slane %v2277_v44, 6 }
 0x8f4   :  { %1692 = vmatmul.msk.f32.vlgmr.msra.gmra.mxu1 %vm73_vm0, %v904_v45 }
 0x8f5   :  { %v710_v48 = vpop.permute.xlu0 %709 }
 0x8f6   :  { %v712_v54 = vmul.f32 %v710_v48, %v707_v46 }
 0x8f8   :  { %v718_v56 = vadd.f32 %v717_v52, %v712_v54 }
 0x8fa   :  { %v719_v57 = vsub.f32 %v718_v56, %v715_v10 }
 0x8fc   :  { %721 = vrot.lane.b32.xlu0 %v719_v57, %s1911_s24 }
 0x96e   :  { %v722_v18 = vpop.permute.xlu0 %721 }
 0x96f   :  { %v724_v58 = vmul.f32 %v722_v18, %v2154_v51 }
 0x971   :  { %v726_v59 = vrot.slane %v724_v58, 6  ;;  %v924_v61 = vpop.f32.mrf.mxu1 }
 0x972   :  { %v925_v50 = vadd.f32 %v2082_v15, %v924_v61 }
 0x973   :  { %v2287_v62 = vadd.f32 %v726_v59, %v2246_v33 }
 0x974   :  { %v928_v63 = vrot.slane %v925_v50, 2 }
 0x975   :  { %1690 = vmatmul.msk.f32.vlgmr.msra.gmra.mxu0 %vm73_vm0, %v2287_v62 }
 0x976   :  { %929 = vrot.lane.b32.xlu0 %v928_v63, %s1911_s24 }
 0x9e8   :  { %v930_v15 = vpop.permute.xlu0 %929 }
 0x9e9   :  { %v932_v9 = vadd.f32 %v930_v15, %v2119_v30  ;;  %v933_v52 = vadd.f32 %v930_v15, %v2125_v55 }
 0x9eb   :  { %v1693_v11 = vmul.f32 -1.442695, %v932_v9  ;;  %v1694_v54 = vmul.f32 -1.442695, %v933_v52 }
 0x9f2   :  { %v850_v60 = vpop.f32.mrf.mxu0 }
 0x9f3   :  { %v851_v2 = vadd.f32 %v2105_v25, %v850_v60 }
 0x9f5   :  { %874 = vrot.lane.b32.xlu2 %v851_v2, %s1913_s2  ;;  %v853_v4 = vadd.f32 %v851_v2, %v2122_v37 }
 0x9f7   :  { %v1691_v7 = vmul.f32 -1.442695, %v853_v4 }
 0x9f9   :  { %1786 = vpow2.f32 %v1691_v7 }
 0x9fa   :  { %1788 = vpow2.f32 %v1693_v11 }
 0x9fd   :  { %972 = vrot.lane.b32.xlu2 %v928_v63, %s1912_s25 }
 0x9ff   :  { %v1787_v0 = vpop.eup %1786 }
 0xa00   :  { %v857_v14 = vadd.f32 1.0, %v1787_v0  ;;  %v1789_v19 = vpop.eup %1788 }
 0xa01   :  { %v937_v21 = vadd.f32 1.0, %v1789_v19 }
 0xa02   :  { %1790 = vrcp.f32 %v857_v14  ;;  %v869_v1 = vand.u32 2147483648, %v857_v14  ;;  %vm863_vm5 = vweird.f32 %v857_v14  ;;  %v867_v3 = vand.u32 2147483647, %v857_v14 }
 0xa03   :  { %1792 = vrcp.f32 %v937_v21  ;;  %v949_v38 = vand.u32 2147483648, %v937_v21  ;;  %vm943_vm9 = vweird.f32 %v937_v21  ;;  %v947_v16 = vand.u32 2147483647, %v937_v21 }
 0xa04   :  { %v870_v20 = vor.u32 1.1754944e-38, %v869_v1  ;;  %vm868_vm7 = vcmp.eq.f32.partialorder %v867_v3, 8.507059e+37 }
 0xa05   :  { %v950_v12 = vor.u32 1.1754944e-38, %v949_v38  ;;  %vm948_vm11 = vcmp.eq.f32.partialorder %v947_v16, 8.507059e+37 }
 0xa08   :  { %v1791_v22 = vpop.eup %1790 }
 0xa09   :  { %v859_v25 = vmul.f32 %v1791_v22, %v857_v14  ;;  %v1793_v24 = vpop.eup %1792  ;;  %vm864_vm4 = vweird.f32 %v1791_v22 }
 0xa0a   :  { %v939_v28 = vmul.f32 %v1793_v24, %v937_v21  ;;  %vm865_vm6 = vmor %vm863_vm5, %vm864_vm4  ;;  %vm944_vm8 = vweird.f32 %v1793_v24 }
 0xa0b   :  { %v860_v23 = vsub.f32 1.0, %v859_v25  ;;  %vm945_vm10 = vmor %vm943_vm9, %vm944_vm8 }
 0xa0c   :  { %v940_v31 = vsub.f32 1.0, %v939_v28 }
 0xa0d   :  { %v861_v27 = vmul.f32 %v1791_v22, %v860_v23 }
 0xa0e   :  { %v941_v8 = vmul.f32 %v1793_v24, %v940_v31 }
 0xa0f   :  { %v862_v29 = vadd.f32 %v1791_v22, %v861_v27 }
 0xa10   :  { %v942_v36 = vadd.f32 %v1793_v24, %v941_v8 }
 0xa11   :  { %v866_v5 = vsel %vm865_vm6, %v1791_v22, %v862_v29 }
 0xa12   :  { %v871_v34 = vsel %vm868_vm7, %v870_v20, %v866_v5  ;;  %v946_v35 = vsel %vm945_vm10, %v1793_v24, %v942_v36  ;;  %v2324_v20 = vld [vmem:[%s2584_s7] ss:$0 sm:$0xff] }
 0xa13   :  { %v951_v39 = vsel %vm948_vm11, %v950_v12, %v946_v35  ;;  %v884_v24 = vsub.f32 1.0, %v871_v34 }
 0xa4f   :  { %v875_v6 = vpop.permute.xlu2 %874 }
 0xa50   :  { %v877_v10 = vmul.f32 %v875_v6, %v871_v34 }
 0xa52   :  { %879 = vrot.lane.b32.xlu1 %v877_v10, %s1913_s2 }
 0xa57   :  { %v973_v13 = vpop.permute.xlu2 %972 }
 0xa58   :  { %v975_v40 = vmul.f32 %v973_v13, %v951_v39 }
 0xa5a   :  { %890 = vrot.lane.b32.xlu1 %v2287_v62, %s1912_s25  ;;  %977 = vrot.lane.b32.xlu2 %v975_v40, %s1913_s2 }
 0xab4   :  { %v978_v41 = vpop.permute.xlu2 %977 }
 0xab5   :  { %v980_v42 = vadd.f32 %v978_v41, %v2125_v55 }
 0xab7   :  { %1794 = vtanh.f32 %v980_v42 }
 0xabd   :  { %v1795_v43 = vpop.eup %1794 }
 0xabe   :  { %984 = vrot.lane.b32.xlu1 %v1795_v43, %s1911_s24 }
 0xac4   :  { %v880_v45 = vpop.permute.xlu1 %879 }
 0xac5   :  { %v882_v46 = vadd.f32 %v880_v45, %v2122_v37 }
 0xac7   :  { %1796 = vtanh.f32 %v882_v46 }
 0xac8   :  { %1798 = vpow2.f32 %v1694_v54 }
 0xacc   :  { %v891_v2 = vpop.permute.xlu1 %890 }
 0xacd   :  { %v1797_v48 = vpop.eup %1796  ;;  %v893_v28 = vmul.f32 %v891_v2, %v871_v34 }
 0xace   :  { %886 = vrot.lane.b32.xlu0 %v1797_v48, %s1911_s24  ;;  %v1799_v56 = vpop.eup %1798 }
 0xacf   :  { %v956_v57 = vadd.f32 1.0, %v1799_v56 }
 0xad1   :  { %1800 = vrcp.f32 %v956_v57  ;;  %v968_v63 = vand.u32 2147483648, %v956_v57  ;;  %vm962_vm13 = vweird.f32 %v956_v57  ;;  %v966_v60 = vand.u32 2147483647, %v956_v57 }
 0xad3   :  { %v969_v7 = vor.u32 1.1754944e-38, %v968_v63  ;;  %vm967_vm15 = vcmp.eq.f32.partialorder %v966_v60, 8.507059e+37 }
 0xad7   :  { %v1801_v18 = vpop.eup %1800 }
 0xad8   :  { %v958_v58 = vmul.f32 %v1801_v18, %v956_v57  ;;  %vm963_vm12 = vweird.f32 %v1801_v18 }
 0xad9   :  { %vm964_vm14 = vmor %vm962_vm13, %vm963_vm12 }
 0xada   :  { %v959_v59 = vsub.f32 1.0, %v958_v58 }
 0xadc   :  { %v960_v61 = vmul.f32 %v1801_v18, %v959_v59 }
 0xade   :  { %v961_v50 = vadd.f32 %v1801_v18, %v960_v61 }
 0xae0   :  { %v965_v4 = vsel %vm964_vm14, %v1801_v18, %v961_v50 }
 0xae1   :  { %v970_v15 = vsel %vm967_vm15, %v969_v7, %v965_v4 }
 0xae2   :  { %v982_v9 = vsub.f32 1.0, %v970_v15  ;;  %v988_v0 = vmul.f32 %v970_v15, %v2277_v44 }
 0xb30   :  { %v985_v11 = vpop.permute.xlu1 %984 }
 0xb31   :  { %v987_v14 = vmul.f32 %v985_v11, %v982_v9 }
 0xb33   :  { %v989_v19 = vadd.f32 %v988_v0, %v987_v14 }
 0xb35   :  { %v990_v21 = vsub.f32 %v989_v19, %v2277_v44 }
 0xb37   :  { %v991_v22 = vmul.f32 %v990_v21, %v2154_v51 }
 0xb39   :  { %v2310_v25 = vadd.f32 %v991_v22, %v2277_v44 }
 0xb3b   :  { %v1076_v23 = vrot.slane %v2310_v25, 6 }
 0xb3d   :  { %1697 = vmatmul.msk.f32.vlgmr.msra.gmra.mxu3 %vm73_vm0, %v1076_v23 }
 0xb40   :  { %v887_v27 = vpop.permute.xlu0 %886 }
 0xb41   :  { %v889_v29 = vmul.f32 %v887_v27, %v884_v24 }
 0xb43   :  { %v894_v31 = vadd.f32 %v893_v28, %v889_v29 }
 0xb45   :  { %v895_v1 = vsub.f32 %v894_v31, %v891_v2 }
 0xb47   :  { %897 = vrot.lane.b32.xlu0 %v895_v1, %s1911_s24 }
 0xbb9   :  { %v898_v3 = vpop.permute.xlu0 %897 }
 0xbba   :  { %v900_v5 = vmul.f32 %v898_v3, %v2140_v47  ;;  %v2331_v47 = vld [vmem:[%s2582_s5] ss:$0 sm:$0xff] }
 0xbbc   :  { %v2317_v51 = vadd.f32 %v900_v5, %v2287_v62 }
 0xbbe   :  { %1695 = vmatmul.msk.f32.vlgmr.msra.gmra.mxu2 %vm73_vm0, %v2317_v51  ;;  %v1058_v22 = vrot.slane %v2317_v51, 6 }
 0xbc0   :  { %v1096_v8 = vpop.f32.mrf.mxu3 }
 0xbc1   :  { %v1097_v6 = vadd.f32 %v2324_v20, %v1096_v8 }
 0xbc3   :  { %v1100_v34 = vrot.slane %v1097_v6, 4 }
 0xbc5   :  { %1101 = vrot.lane.b32.xlu0 %v1100_v34, %s1911_s24 }
 0xc37   :  { %v1102_v12 = vpop.permute.xlu0 %1101 }
 0xc38   :  { %v1104_v13 = vadd.f32 %v1102_v12, %v2119_v30  ;;  %v1105_v1 = vadd.f32 %v1102_v12, %v2125_v55 }
 0xc3a   :  { %v1698_v39 = vmul.f32 -1.442695, %v1104_v13  ;;  %v1699_v3 = vmul.f32 -1.442695, %v1105_v1 }
 0xc41   :  { %v1016_v10 = vpop.f32.mrf.mxu2 }
 0xc42   :  { %v1017_v36 = vadd.f32 %v2331_v47, %v1016_v10 }
 0xc44   :  { %v1020_v38 = vrot.slane %v1017_v36, 6 }
 0xc46   :  { %1042 = vrot.lane.b32.xlu2 %v1020_v38, %s1913_s2  ;;  %v1022_v16 = vadd.f32 %v1020_v38, %v2122_v37 }
 0xc48   :  { %v1696_v35 = vmul.f32 -1.442695, %v1022_v16 }
 0xc4a   :  { %1802 = vpow2.f32 %v1696_v35 }
 0xc4b   :  { %1804 = vpow2.f32 %v1698_v39 }
 0xc4e   :  { %1144 = vrot.lane.b32.xlu2 %v1100_v34, %s1912_s25 }
 0xc50   :  { %v1803_v40 = vpop.eup %1802 }
 0xc51   :  { %v1026_v41 = vadd.f32 1.0, %v1803_v40  ;;  %v1805_v42 = vpop.eup %1804 }
 0xc52   :  { %v1109_v43 = vadd.f32 1.0, %v1805_v42  ;;  %v1160_v42 = vrot.slane %v2310_v25, 2 }
 0xc53   :  { %1806 = vrcp.f32 %v1026_v41  ;;  %v1038_v58 = vand.u32 2147483648, %v1026_v41  ;;  %vm1032_vm2 = vweird.f32 %v1026_v41  ;;  %v1036_v59 = vand.u32 2147483647, %v1026_v41 }
 0xc54   :  { %1808 = vrcp.f32 %v1109_v43  ;;  %v1121_v15 = vand.u32 2147483648, %v1109_v43  ;;  %vm1115_vm6 = vweird.f32 %v1109_v43  ;;  %v1119_v9 = vand.u32 2147483647, %v1109_v43 }
 0xc55   :  { %v1039_v63 = vor.u32 1.1754944e-38, %v1038_v58  ;;  %vm1037_vm4 = vcmp.eq.f32.partialorder %v1036_v59, 8.507059e+37 }
 0xc56   :  { %v1122_v0 = vor.u32 1.1754944e-38, %v1121_v15  ;;  %vm1120_vm8 = vcmp.eq.f32.partialorder %v1119_v9, 8.507059e+37  ;;  %v2368_v15 = vld [vmem:[%s2578_s1 + $0x8] sm:$0xff] }
 0xc59   :  { %v1807_v45 = vpop.eup %1806 }
 0xc5a   :  { %v1028_v46 = vmul.f32 %v1807_v45, %v1026_v41  ;;  %v1809_v52 = vpop.eup %1808  ;;  %vm1033_vm1 = vweird.f32 %v1807_v45 }
 0xc5b   :  { %v1111_v56 = vmul.f32 %v1809_v52, %v1109_v43  ;;  %vm1034_vm3 = vmor %vm1032_vm2, %vm1033_vm1  ;;  %vm1116_vm5 = vweird.f32 %v1809_v52 }
 0xc5c   :  { %v1029_v48 = vsub.f32 1.0, %v1028_v46  ;;  %vm1117_vm7 = vmor %vm1115_vm6, %vm1116_vm5 }
 0xc5d   :  { %v1112_v18 = vsub.f32 1.0, %v1111_v56 }
 0xc5e   :  { %v1030_v54 = vmul.f32 %v1807_v45, %v1029_v48 }
 0xc5f   :  { %v1113_v50 = vmul.f32 %v1809_v52, %v1112_v18 }
 0xc60   :  { %v1031_v57 = vadd.f32 %v1807_v45, %v1030_v54  ;;  %v2354_v54 = vld [vmem:[%s2578_s1] sm:$0xff] }
 0xc61   :  { %v1114_v7 = vadd.f32 %v1809_v52, %v1113_v50 }
 0xc62   :  { %v1035_v61 = vsel %vm1034_vm3, %v1807_v45, %v1031_v57 }
 0xc63   :  { %v2338_v2 = vsel %vm1037_vm4, %v1039_v63, %v1035_v61  ;;  %v1118_v11 = vsel %vm1117_vm7, %v1809_v52, %v1114_v7 }
 0xc64   :  { %v1123_v19 = vsel %vm1120_vm8, %v1122_v0, %v1118_v11  ;;  %v1052_v59 = vsub.f32 1.0, %v2338_v2 }
 0xca0   :  { %v1043_v60 = vpop.permute.xlu2 %1042 }
 0xca1   :  { %v1045_v4 = vmul.f32 %v1043_v60, %v2338_v2 }
 0xca3   :  { %1047 = vrot.lane.b32.xlu1 %v1045_v4, %s1913_s2 }
 0xca8   :  { %v1145_v14 = vpop.permute.xlu2 %1144 }
 0xca9   :  { %v1147_v21 = vmul.f32 %v1145_v14, %v1123_v19 }
 0xcab   :  { %1059 = vrot.lane.b32.xlu1 %v1058_v22, %s1912_s25  ;;  %1149 = vrot.lane.b32.xlu2 %v1147_v21, %s1913_s2 }
 0xd05   :  { %v1150_v23 = vpop.permute.xlu2 %1149 }
 0xd06   :  { %v1152_v24 = vadd.f32 %v1150_v23, %v2125_v55 }
 0xd08   :  { %1810 = vtanh.f32 %v1152_v24 }
 0xd0e   :  { %v1811_v27 = vpop.eup %1810 }
 0xd0f   :  { %1156 = vrot.lane.b32.xlu1 %v1811_v27, %s1911_s24 }
 0xd15   :  { %v1048_v28 = vpop.permute.xlu1 %1047 }
 0xd16   :  { %v1050_v29 = vadd.f32 %v1048_v28, %v2122_v37 }
 0xd18   :  { %1812 = vtanh.f32 %v1050_v29 }
 0xd19   :  { %1814 = vpow2.f32 %v1699_v3 }
 0xd1d   :  { %v1060_v13 = vpop.permute.xlu1 %1059 }
 0xd1e   :  { %v1813_v31 = vpop.eup %1812  ;;  %v1062_v50 = vmul.f32 %v1060_v13, %v2338_v2 }
 0xd1f   :  { %1054 = vrot.lane.b32.xlu0 %v1813_v31, %s1911_s24  ;;  %v1815_v5 = vpop.eup %1814 }
 0xd20   :  { %v1128_v8 = vadd.f32 1.0, %v1815_v5 }
 0xd22   :  { %1816 = vrcp.f32 %v1128_v8  ;;  %v1140_v16 = vand.u32 2147483648, %v1128_v8  ;;  %vm1134_vm10 = vweird.f32 %v1128_v8  ;;  %v1138_v35 = vand.u32 2147483647, %v1128_v8 }
 0xd24   :  { %v1141_v40 = vor.u32 1.1754944e-38, %v1140_v16  ;;  %vm1139_vm12 = vcmp.eq.f32.partialorder %v1138_v35, 8.507059e+37 }
 0xd28   :  { %v1817_v6 = vpop.eup %1816 }
 0xd29   :  { %v1130_v34 = vmul.f32 %v1817_v6, %v1128_v8  ;;  %vm1135_vm9 = vweird.f32 %v1817_v6 }
 0xd2a   :  { %vm1136_vm11 = vmor %vm1134_vm10, %vm1135_vm9 }
 0xd2b   :  { %v1131_v10 = vsub.f32 1.0, %v1130_v34 }
 0xd2d   :  { %v1132_v36 = vmul.f32 %v1817_v6, %v1131_v10 }
 0xd2f   :  { %v1133_v38 = vadd.f32 %v1817_v6, %v1132_v36 }
 0xd31   :  { %v1137_v39 = vsel %vm1136_vm11, %v1817_v6, %v1133_v38 }
 0xd32   :  { %v1142_v12 = vsel %vm1139_vm12, %v1141_v40, %v1137_v39 }
 0xd33   :  { %v1154_v41 = vsub.f32 1.0, %v1142_v12  ;;  %v1162_v45 = vmul.f32 %v1160_v42, %v1142_v12 }
 0xd81   :  { %v1157_v43 = vpop.permute.xlu1 %1156 }
 0xd82   :  { %v1159_v46 = vmul.f32 %v1157_v43, %v1154_v41 }
 0xd84   :  { %v1163_v48 = vadd.f32 %v1162_v45, %v1159_v46 }
 0xd86   :  { %v1164_v52 = vsub.f32 %v1163_v48, %v1160_v42 }
 0xd88   :  { %v1165_v56 = vmul.f32 %v2354_v54, %v1164_v52 }
 0xd8a   :  { %v1167_v57 = vrot.slane %v1165_v56, 6 }
 0xd8c   :  { %v2358_v18 = vadd.f32 %v1167_v57, %v2310_v25 }
 0xd8e   :  { %v1253_v58 = vrot.slane %v2358_v18, 6 }
 0xd90   :  { %1702 = vmatmul.msk.f32.vlgmr.msrb.gmra.mxu1 %vm73_vm0, %v1253_v58 }
 0xd91   :  { %v1055_v61 = vpop.permute.xlu0 %1054 }
 0xd92   :  { %v1057_v63 = vmul.f32 %v1055_v61, %v1052_v59 }
 0xd94   :  { %v1063_v60 = vadd.f32 %v1062_v50, %v1057_v63 }
 0xd96   :  { %v1064_v4 = vsub.f32 %v1063_v60, %v1060_v13 }
 0xd98   :  { %1066 = vrot.lane.b32.xlu0 %v1064_v4, %s1911_s24 }
 0xe0a   :  { %v1067_v7 = vpop.permute.xlu0 %1066 }
 0xe0b   :  { %v1069_v9 = vmul.f32 %v2368_v15, %v1067_v7 }
 0xe0d   :  { %v1071_v11 = vrot.slane %v1069_v9, 2  ;;  %v1273_v0 = vpop.f32.mrf.mxu1 }
 0xe0e   :  { %v1274_v14 = vadd.f32 %v2324_v20, %v1273_v0 }
 0xe0f   :  { %v2373_v19 = vadd.f32 %v1071_v11, %v2317_v51 }
 0xe10   :  { %v1277_v2 = vrot.slane %v1274_v14, 6 }
 0xe11   :  { %1700 = vmatmul.msk.f32.vlgmr.msrb.gmra.mxu0 %vm73_vm0, %v2373_v19  ;;  %v1235_v24 = vrot.slane %v2373_v19, 4 }
 0xe12   :  { %1278 = vrot.lane.b32.xlu0 %v1277_v2, %s1911_s24 }
 0xe84   :  { %v1279_v29 = vpop.permute.xlu0 %1278 }
 0xe85   :  { %v1281_v31 = vadd.f32 %v1279_v29, %v2119_v30  ;;  %v1282_v14 = vadd.f32 %v1279_v29, %v2125_v55 }
 0xe87   :  { %v1703_v1 = vmul.f32 -1.442695, %v1281_v31 }
 0xe8e   :  { %v1193_v21 = vpop.f32.mrf.mxu0 }
 0xe8f   :  { %v1194_v22 = vadd.f32 %v2331_v47, %v1193_v21 }
 0xe91   :  { %v1197_v23 = vrot.slane %v1194_v22, 4 }
 0xe93   :  { %1219 = vrot.lane.b32.xlu2 %v1197_v23, %s1913_s2  ;;  %v1199_v27 = vadd.f32 %v1197_v23, %v2122_v37 }
 0xe95   :  { %v1701_v28 = vmul.f32 -1.442695, %v1199_v27 }
 0xe97   :  { %1818 = vpow2.f32 %v1701_v28 }
 0xe98   :  { %1820 = vpow2.f32 %v1703_v1 }
 0xe9b   :  { %1321 = vrot.lane.b32.xlu2 %v1277_v2, %s1912_s25  ;;  %v1704_v2 = vmul.f32 -1.442695, %v1282_v14 }
 0xe9d   :  { %v1819_v3 = vpop.eup %1818 }
 0xe9e   :  { %v1203_v5 = vadd.f32 1.0, %v1819_v3  ;;  %v1821_v8 = vpop.eup %1820 }
 0xe9f   :  { %v1286_v6 = vadd.f32 1.0, %v1821_v8 }
 0xea0   :  { %1822 = vrcp.f32 %v1203_v5  ;;  %v1215_v40 = vand.u32 2147483648, %v1203_v5  ;;  %vm1209_vm14 = vweird.f32 %v1203_v5  ;;  %v1213_v12 = vand.u32 2147483647, %v1203_v5 }
 0xea1   :  { %1824 = vrcp.f32 %v1286_v6  ;;  %v1298_v56 = vand.u32 2147483648, %v1286_v6  ;;  %vm1292_vm3 = vweird.f32 %v1286_v6  ;;  %v1296_v57 = vand.u32 2147483647, %v1286_v6 }
 0xea2   :  { %v1216_v43 = vor.u32 1.1754944e-38, %v1215_v40  ;;  %vm1214_vm1 = vcmp.eq.f32.partialorder %v1213_v12, 8.507059e+37 }
 0xea3   :  { %1236 = vrot.lane.b32.xlu2 %v1235_v24, %s1912_s25  ;;  %v1299_v59 = vor.u32 1.1754944e-38, %v1298_v56  ;;  %vm1297_vm5 = vcmp.eq.f32.partialorder %v1296_v57, 8.507059e+37 }
 0xea6   :  { %v1823_v34 = vpop.eup %1822 }
 0xea7   :  { %v1205_v10 = vmul.f32 %v1823_v34, %v1203_v5  ;;  %v1825_v38 = vpop.eup %1824  ;;  %vm1210_vm13 = vweird.f32 %v1823_v34 }
 0xea8   :  { %v1288_v35 = vmul.f32 %v1825_v38, %v1286_v6  ;;  %vm1211_vm15 = vmor %vm1209_vm14, %vm1210_vm13  ;;  %vm1293_vm2 = vweird.f32 %v1825_v38 }
 0xea9   :  { %v1206_v36 = vsub.f32 1.0, %v1205_v10  ;;  %vm1294_vm4 = vmor %vm1292_vm3, %vm1293_vm2 }
 0xeaa   :  { %v1289_v39 = vsub.f32 1.0, %v1288_v35 }
 0xeab   :  { %v1207_v16 = vmul.f32 %v1823_v34, %v1206_v36 }
 0xeac   :  { %v1290_v42 = vmul.f32 %v1825_v38, %v1289_v39  ;;  %v1337_v39 = vrot.slane %v2358_v18, 4 }
 0xead   :  { %v1208_v13 = vadd.f32 %v1823_v34, %v1207_v16 }
 0xeae   :  { %v1291_v52 = vadd.f32 %v1825_v38, %v1290_v42 }
 0xeaf   :  { %v1212_v41 = vsel %vm1211_vm15, %v1823_v34, %v1208_v13 }
 0xeb0   :  { %v1217_v46 = vsel %vm1214_vm1, %v1216_v43, %v1212_v41  ;;  %v1295_v58 = vsel %vm1294_vm4, %v1825_v38, %v1291_v52 }
 0xeb1   :  { %v1300_v50 = vsel %vm1297_vm5, %v1299_v59, %v1295_v58  ;;  %v1229_v5 = vsub.f32 1.0, %v1217_v46 }
 0xeed   :  { %v1220_v45 = vpop.permute.xlu2 %1219 }
 0xeee   :  { %v1222_v48 = vmul.f32 %v1220_v45, %v1217_v46 }
 0xef0   :  { %1224 = vrot.lane.b32.xlu1 %v1222_v48, %s1913_s2 }
 0xef5   :  { %v1322_v61 = vpop.permute.xlu2 %1321 }
 0xef6   :  { %v1324_v63 = vmul.f32 %v1322_v61, %v1300_v50 }
 0xef8   :  { %1326 = vrot.lane.b32.xlu0 %v1324_v63, %s1913_s2 }
 0xefd   :  { %v1237_v1 = vpop.permute.xlu2 %1236 }
 0xefe   :  { %v1239_v34 = vmul.f32 %v1237_v1, %v1217_v46 }
 0xf62   :  { %v1225_v60 = vpop.permute.xlu1 %1224 }
 0xf63   :  { %v1227_v4 = vadd.f32 %v1225_v60, %v2122_v37 }
 0xf65   :  { %1826 = vtanh.f32 %v1227_v4 }
 0xf6a   :  { %v1327_v7 = vpop.permute.xlu0 %1326 }
 0xf6b   :  { %v1827_v9 = vpop.eup %1826  ;;  %v1329_v11 = vadd.f32 %v1327_v7, %v2125_v55 }
 0xf6c   :  { %1231 = vrot.lane.b32.xlu1 %v1827_v9, %s1911_s24 }
 0xf6d   :  { %1828 = vtanh.f32 %v1329_v11 }
 0xf6e   :  { %1830 = vpow2.f32 %v1704_v2 }
 0xf73   :  { %v1829_v0 = vpop.eup %1828 }
 0xf74   :  { %1333 = vrot.lane.b32.xlu0 %v1829_v0, %s1911_s24  ;;  %v1831_v21 = vpop.eup %1830 }
 0xf75   :  { %v1305_v22 = vadd.f32 1.0, %v1831_v21 }
 0xf77   :  { %1832 = vrcp.f32 %v1305_v22  ;;  %v1317_v3 = vand.u32 2147483648, %v1305_v22  ;;  %vm1311_vm7 = vweird.f32 %v1305_v22  ;;  %v1315_v8 = vand.u32 2147483647, %v1305_v22 }
 0xf79   :  { %v1318_v36 = vor.u32 1.1754944e-38, %v1317_v3  ;;  %vm1316_vm9 = vcmp.eq.f32.partialorder %v1315_v8, 8.507059e+37 }
 0xf7d   :  { %v1833_v23 = vpop.eup %1832 }
 0xf7e   :  { %v1307_v24 = vmul.f32 %v1833_v23, %v1305_v22  ;;  %vm1312_vm6 = vweird.f32 %v1833_v23 }
 0xf7f   :  { %vm1313_vm8 = vmor %vm1311_vm7, %vm1312_vm6  ;;  %vm1540_vm7 = vcmask 523264  }
 0xf80   :  { %v1308_v27 = vsub.f32 1.0, %v1307_v24 }
 0xf82   :  { %v1309_v28 = vmul.f32 %v1833_v23, %v1308_v27 }
 0xf84   :  { %v1310_v31 = vadd.f32 %v1833_v23, %v1309_v28 }
 0xf86   :  { %v1314_v10 = vsel %vm1313_vm8, %v1833_v23, %v1310_v31  ;;  %vm1542_vm8 = vcmask 785408  }
 0xf87   :  { %v1319_v16 = vsel %vm1316_vm9, %v1318_v36, %v1314_v10 }
 0xf88   :  { %v1331_v13 = vsub.f32 1.0, %v1319_v16  ;;  %v1339_v12 = vmul.f32 %v1337_v39, %v1319_v16 }
 0xfde   :  { %v1232_v6 = vpop.permute.xlu1 %1231 }
 0xfdf   :  { %v1234_v29 = vmul.f32 %v1232_v6, %v1229_v5 }
 0xfe1   :  { %v1240_v38 = vadd.f32 %v1239_v34, %v1234_v29 }
 0xfe3   :  { %v1241_v35 = vsub.f32 %v1240_v38, %v1237_v1 }
 0xfe5   :  { %1243 = vrot.lane.b32.xlu1 %v1241_v35, %s1911_s24 }
 0xfe6   :  { %v1334_v40 = vpop.permute.xlu0 %1333 }
 0xfe7   :  { %v1336_v41 = vmul.f32 %v1334_v40, %v1331_v13 }
 0xfe9   :  { %v1340_v42 = vadd.f32 %v1339_v12, %v1336_v41 }
 0xfeb   :  { %v1341_v43 = vsub.f32 %v1340_v42, %v1337_v39 }
 0xfed   :  { %v1342_v45 = vmul.f32 %v2354_v54, %v1341_v43 }
 0xfef   :  { %v1344_v46 = vrot.slane %v1342_v45, 4 }
 0xff1   :  { %v2396_v48 = vadd.f32 %v1344_v46, %v2358_v18 }
 0xff3   :  { %v2399_v52 = vrot.slane %v2396_v48, 6 }
 0xff5   :  { %1707 = vmatmul.msk.f32.vlgmr.msrb.gmra.mxu3 %vm73_vm0, %v2399_v52 }
0x1057   :  { %v1244_v56 = vpop.permute.xlu1 %1243 }
0x1058   :  { %v1246_v57 = vmul.f32 %v2368_v15, %v1244_v56 }
0x105a   :  { %v1248_v58 = vrot.slane %v1246_v57, 4 }
0x105c   :  { %v2405_v59 = vadd.f32 %v1248_v58, %v2373_v19 }
0x105e   :  { %1705 = vmatmul.msk.f32.vlgmr.msrb.gmra.mxu2 %vm73_vm0, %v2405_v59  ;;  %v1412_v42 = vrot.slane %v2405_v59, 2 }
0x1078   :  { %v1450_v61 = vpop.f32.mrf.mxu3 }
0x1079   :  { %v1451_v50 = vadd.f32 %v2324_v20, %v1450_v61 }
0x107b   :  { %1454 = vrot.lane.b32.xlu0 %v1451_v50, %s1911_s24  ;;  %1497 = vrot.lane.b32.xlu1 %v1451_v50, %s1912_s25 }
0x10e1   :  { %v1370_v63 = vpop.f32.mrf.mxu2 }
0x10e2   :  { %v1371_v60 = vadd.f32 %v2331_v47, %v1370_v63 }
0x10e4   :  { %v1374_v4 = vrot.slane %v1371_v60, 2 }
0x10e6   :  { %1396 = vrot.lane.b32.xlu2 %v1374_v4, %s1913_s2  ;;  %v1376_v3 = vadd.f32 %v1374_v4, %v2122_v37 }
0x10e8   :  { %v1706_v5 = vmul.f32 -1.442695, %v1376_v3 }
0x10ed   :  { %v1455_v7 = vpop.permute.xlu0 %1454 }
0x10ee   :  { %v1457_v9 = vadd.f32 %v1455_v7, %v2119_v30  ;;  %v1498_v30 = vpop.permute.xlu1 %1497  ;;  %v1458_v61 = vadd.f32 %v1455_v7, %v2125_v55  ;;  %v646_v7 = vrot.slane %v2368_v15, 4 }
0x10f0   :  { %v1708_v11 = vmul.f32 -1.442695, %v1457_v9  ;;  %v1709_v50 = vmul.f32 -1.442695, %v1458_v61  ;;  %v1558_v61 = vld [vmem:[%s2585_s8 + $0x70] sm:$0xff] }
0x10f2   :  { %1834 = vpow2.f32 %v1708_v11 }
0x10f8   :  { %v1835_v0 = vpop.eup %1834 }
0x10f9   :  { %v1462_v14 = vadd.f32 1.0, %v1835_v0 }
0x10fb   :  { %1836 = vrcp.f32 %v1462_v14  ;;  %v1474_v22 = vand.u32 2147483648, %v1462_v14  ;;  %v1472_v24 = vand.u32 2147483647, %v1462_v14  ;;  %vm1468_vm11 = vweird.f32 %v1462_v14 }
0x10fc   :  { %1838 = vpow2.f32 %v1706_v5 }
0x10fd   :  { %v1475_v47 = vor.u32 1.1754944e-38, %v1474_v22  ;;  %vm1473_vm13 = vcmp.eq.f32.partialorder %v1472_v24, 8.507059e+37  ;;  %v465_v22 = vrot.slane %v2368_v15, 6  ;;  %v825_v24 = vrot.slane %v2368_v15, 2 }
0x1101   :  { %v1837_v2 = vpop.eup %1836 }
0x1102   :  { %v1464_v20 = vmul.f32 %v1837_v2, %v1462_v14  ;;  %vm1469_vm10 = vweird.f32 %v1837_v2  ;;  %v1839_v8 = vpop.eup %1838 }
0x1103   :  { %vm1470_vm12 = vmor %vm1468_vm11, %vm1469_vm10  ;;  %v1380_v6 = vadd.f32 1.0, %v1839_v8  ;;  %v729_v8 = vrot.slane %v2354_v54, 6 }
0x1104   :  { %v1465_v21 = vsub.f32 1.0, %v1464_v20 }
0x1105   :  { %1840 = vrcp.f32 %v1380_v6  ;;  %v1392_v16 = vand.u32 2147483648, %v1380_v6  ;;  %vm1386_vm15 = vweird.f32 %v1380_v6  ;;  %v1390_v35 = vand.u32 2147483647, %v1380_v6 }
0x1106   :  { %v1466_v23 = vmul.f32 %v1837_v2, %v1465_v21 }
0x1107   :  { %v1393_v39 = vor.u32 1.1754944e-38, %v1392_v16  ;;  %vm1391_vm2 = vcmp.eq.f32.partialorder %v1390_v35, 8.507059e+37 }
0x1108   :  { %v1467_v27 = vadd.f32 %v1837_v2, %v1466_v23  ;;  %v467_v23 = vmul.f32 %v465_v22, %v2187_v26  ;;  %v827_v26 = vmul.f32 %v825_v24, %v2277_v44 }
0x110a   :  { %v1471_v28 = vsel %vm1470_vm12, %v1837_v2, %v1467_v27 }
0x110b   :  { %v1476_v31 = vsel %vm1473_vm13, %v1475_v47, %v1471_v28  ;;  %v1841_v34 = vpop.eup %1840  ;;  %v286_v28 = vmul.f32 %v2368_v15, %v2143_v49  ;;  %v993_v49 = vmul.f32 %v2354_v54, %v2310_v25 }
0x110c   :  { %v1500_v1 = vmul.f32 %v1498_v30, %v1476_v31  ;;  %v1382_v29 = vmul.f32 %v1841_v34, %v1380_v6  ;;  %vm1387_vm14 = vweird.f32 %v1841_v34  ;;  %v648_v31 = vmul.f32 %v646_v7, %v2230_v17 }
0x110d   :  { %vm1388_vm1 = vmor %vm1386_vm15, %vm1387_vm14  ;;  %v469_v5 = vmax.f32 %v286_v28, %v467_v23  ;;  %v548_v17 = vrot.slane %v2354_v54, 4  ;;  %v1544_v28 = vld [vmem:[%s2585_s8] sm:$0xff] }
0x110e   :  { %1502 = vrot.lane.b32.xlu0 %v1500_v1, %s1913_s2  ;;  %v1383_v10 = vsub.f32 1.0, %v1382_v29 }
0x110f   :  { %v1347_v44 = vmul.f32 %v2396_v48, %v548_v17 }
0x1110   :  { %v1384_v36 = vmul.f32 %v1841_v34, %v1383_v10 }
0x1112   :  { %v1385_v38 = vadd.f32 %v1841_v34, %v1384_v36  ;;  %v1170_v36 = vmul.f32 %v2358_v18, %v729_v8 }
0x1114   :  { %v1389_v13 = vsel %vm1388_vm1, %v1841_v34, %v1385_v38  ;;  %v650_v34 = vmax.f32 %v469_v5, %v648_v31  ;;  %v1592_v31 = vld [vmem:[%s2587_s10 + $0x38] sm:$0xff] }
0x1115   :  { %v2417_v12 = vsel %vm1391_vm2, %v1393_v39, %v1389_v13  ;;  %1608 = vmatpush.msra.mxu1 %v1592_v31  ;;  %v1588_v5 = vld [vmem:[%s2587_s10 + $0x18] sm:$0xff] }
0x1116   :  { %v829_v10 = vmax.f32 %v650_v34, %v827_v26  ;;  %v550_v34 = vmul.f32 %v548_v17, %v2246_v33 }
0x1118   :  { %v995_v16 = vmax.f32 %v829_v10, %v993_v49  ;;  %v731_v49 = vmul.f32 %v729_v8, %v2287_v62  ;;  %v902_v10 = vmul.f32 %v2368_v15, %v2317_v51 }
0x111a   :  { %v1172_v35 = vmax.f32 %v995_v16, %v1170_v36 }
0x111c   :  { %v1349_v13 = vmax.f32 %v1172_v35, %v1347_v44 }
0x1140   :  { %v1397_v40 = vpop.permute.xlu2 %1396 }
0x1141   :  { %v1399_v41 = vmul.f32 %v1397_v40, %v2417_v12 }
0x1143   :  { %1401 = vrot.lane.b32.xlu2 %v1399_v41, %s1913_s2 }
0x114b   :  { %1413 = vrot.lane.b32.xlu2 %v1412_v42, %s1912_s25  ;;  %v1406_v42 = vsub.f32 1.0, %v2417_v12 }
0x1180   :  { %v1503_v43 = vpop.permute.xlu0 %1502 }
0x1181   :  { %v1505_v45 = vadd.f32 %v1503_v43, %v2125_v55 }
0x1183   :  { %1842 = vtanh.f32 %v1505_v45 }
0x1189   :  { %v1843_v46 = vpop.eup %1842 }
0x118a   :  { %1509 = vrot.lane.b32.xlu0 %v1843_v46, %s1911_s24 }
0x119d   :  { %v1402_v56 = vpop.permute.xlu2 %1401 }
0x119e   :  { %v1404_v57 = vadd.f32 %v1402_v56, %v2122_v37 }
0x11a0   :  { %1844 = vtanh.f32 %v1404_v57 }
0x11a1   :  { %1846 = vpow2.f32 %v1709_v50  ;;  %v1556_v50 = vld [vmem:[%s2585_s8 + $0x60] sm:$0xff] }
0x11a5   :  { %v1414_v18 = vpop.permute.xlu2 %1413 }
0x11a6   :  { %v1845_v58 = vpop.eup %1844  ;;  %v1416_v45 = vmul.f32 %v1414_v18, %v2417_v12  ;;  %v1557_v12 = vld [vmem:[%s2585_s8 + $0x68] sm:$0xff] }
0x11a7   :  { %1408 = vrot.lane.b32.xlu1 %v1845_v58, %s1911_s24  ;;  %v1847_v63 = vpop.eup %1846  ;;  %v1559_v58 = vld [vmem:[%s2585_s8 + $0x78] sm:$0xff] }
0x11a8   :  { %v1481_v60 = vadd.f32 1.0, %v1847_v63  ;;  %1564 = vmatpush.msra.mxu0 %v1559_v58  ;;  %v1555_v63 = vld [vmem:[%s2585_s8 + $0x58] sm:$0xff] }
0x11aa   :  { %1848 = vrcp.f32 %v1481_v60  ;;  %v1493_v2 = vand.u32 2147483648, %v1481_v60  ;;  %vm1487_vm4 = vweird.f32 %v1481_v60  ;;  %v1491_v37 = vand.u32 2147483647, %v1481_v60  ;;  %1565 = vmatpush.msra.mxu0 %v1558_v61 }
0x11ac   :  { %v1494_v21 = vor.u32 1.1754944e-38, %v1493_v2  ;;  %vm1492_vm6 = vcmp.eq.f32.partialorder %v1491_v37, 8.507059e+37  ;;  %1566 = vmatpush.msra.mxu0 %v1557_v12  ;;  %v1548_v2 = vld [vmem:[%s2585_s8 + $0x20] sm:$0xff]  ;;  %v1547_v37 = vld [vmem:[%s2585_s8 + $0x18] sm:$0xff] }
0x11ae   :  { %1567 = vmatpush.msra.mxu0 %v1556_v50 }
0x11b0   :  { %v1849_v4 = vpop.eup %1848  ;;  %1568 = vmatpush.msra.mxu0 %v1555_v63 }
0x11b1   :  { %v1483_v9 = vmul.f32 %v1849_v4, %v1481_v60  ;;  %vm1488_vm3 = vweird.f32 %v1849_v4  ;;  %v1554_v60 = vld [vmem:[%s2585_s8 + $0x50] sm:$0xff] }
0x11b2   :  { %vm1489_vm5 = vmor %vm1487_vm4, %vm1488_vm3  ;;  %1569 = vmatpush.msra.mxu0 %v1554_v60 }
0x11b3   :  { %v1484_v11 = vsub.f32 1.0, %v1483_v9  ;;  %v1552_v9 = vld [vmem:[%s2585_s8 + $0x40] sm:$0xff] }
0x11b5   :  { %v1485_v0 = vmul.f32 %v1849_v4, %v1484_v11  ;;  %v1551_v11 = vld [vmem:[%s2585_s8 + $0x38] sm:$0xff] }
0x11b7   :  { %v1486_v14 = vadd.f32 %v1849_v4, %v1485_v0  ;;  %v1550_v0 = vld [vmem:[%s2585_s8 + $0x30] sm:$0xff] }
0x11b9   :  { %v1490_v20 = vsel %vm1489_vm5, %v1849_v4, %v1486_v14  ;;  %v1553_v4 = vld [vmem:[%s2585_s8 + $0x48] sm:$0xff] }
0x11ba   :  { %v1495_v55 = vsel %vm1492_vm6, %v1494_v21, %v1490_v20  ;;  %1570 = vmatpush.msra.mxu0 %v1553_v4  ;;  %v1549_v14 = vld [vmem:[%s2585_s8 + $0x28] sm:$0xff] }
0x11bb   :  { %v1507_v27 = vsub.f32 1.0, %v1495_v55  ;;  %v1514_v30 = vmul.f32 %v1495_v55, %v2399_v52  ;;  %v1546_v55 = vld [vmem:[%s2585_s8 + $0x10] sm:$0xff] }
0x11bc   :  { %1571 = vmatpush.msra.mxu0 %v1552_v9 }
0x11be   :  { %1572 = vmatpush.msra.mxu0 %v1551_v11 }
0x11c0   :  { %1573 = vmatpush.msra.mxu0 %v1550_v0 }
0x11c2   :  { %1574 = vmatpush.msra.mxu0 %v1549_v14 }
0x11c4   :  { %1575 = vmatpush.msra.mxu0 %v1548_v2 }
0x11c6   :  { %1576 = vmatpush.msra.mxu0 %v1547_v37 }
0x11c8   :  { %1577 = vmatpush.msra.mxu0 %v1546_v55 }
0x11fc   :  { %v1510_v47 = vpop.permute.xlu0 %1509 }
0x11fd   :  { %v1512_v1 = vmul.f32 %v1510_v47, %v1507_v27  ;;  %v1545_v27 = vld [vmem:[%s2585_s8 + $0x8] sm:$0xff] }
0x11fe   :  { %1578 = vmatpush.msra.mxu0 %v1545_v27 }
0x11ff   :  { %v1515_v3 = vadd.f32 %v1514_v30, %v1512_v1  ;;  %v1591_v30 = vld [vmem:[%s2587_s10 + $0x30] sm:$0xff]  ;;  %v1590_v1 = vld [vmem:[%s2587_s10 + $0x28] sm:$0xff] }
0x1200   :  { %1579 = vmatpush.msra.mxu0 %v1544_v28  ;;  %1609 = vmatpush.msra.mxu1 %v1591_v30 }
0x1201   :  { %v1516_v6 = vsub.f32 %v1515_v3, %v2399_v52  ;;  %v366_v52 = vrot.slane %v2354_v54, 2  ;;  %v1589_v3 = vld [vmem:[%s2587_s10 + $0x20] sm:$0xff] }
0x1202   :  { %1610 = vmatpush.msra.mxu1 %v1590_v1 }
0x1203   :  { %v1517_v29 = vmul.f32 %v2354_v54, %v1516_v6  ;;  %v368_v26 = vmul.f32 %v366_v52, %v2201_v32  ;;  %v197_v6 = vmul.f32 %v2354_v54, %v2157_v53  ;;  %v1074_v32 = vmul.f32 %v2373_v19, %v825_v24 }
0x1204   :  { %1611 = vmatpush.msra.mxu1 %v1589_v3  ;;  %v1251_v53 = vmul.f32 %v2405_v59, %v646_v7  ;;  %v1720_v7 = vld [vmem:[%s2586_s9] ss:$0 sm:$0xff]  ;;  %s1915_s9 = smov 112  }
0x1205   :  { %v1519_v38 = vrot.slane %v1517_v29, 2  ;;  %v468_v29 = vmax.f32 %v197_v6, %v368_v26 }
0x1206   :  { %1612 = vmatpush.msra.mxu1 %v1588_v5 }
0x1207   :  { %v1521_v25 = vadd.f32 %v1519_v38, %v2396_v48  ;;  %v649_v36 = vmax.f32 %v468_v29, %v550_v34 }
0x1209   :  { %v1522_v39 = vmul.f32 %v1521_v25, %v366_v52  ;;  %v1535_v48 = vrot.slane %v1521_v25, 6  ;;  %v828_v38 = vmax.f32 %v649_v36, %v731_v49 }
0x120b   :  { %v1524_v40 = vmax.f32 %v1349_v13, %v1522_v39  ;;  %v994_v16 = vmax.f32 %v828_v38, %v902_v10  ;;  %v1721_v39 = vld [vmem:[%s2588_s11] ss:$0 sm:$0xff]  ;;  %s1916_s11 = smov [#allocation4]  }
0x120d   :  { %v1526_v41 = vrot.slane %v1524_v40, 6  ;;  %v1171_v33 = vmax.f32 %v994_v16, %v1074_v32 }
0x120f   :  { %1527 = vrot.lane.b32.xlu2 %v1526_v41, %s1912_s25  ;;  %v1348_v62 = vmax.f32 %v1171_v33, %v1251_v53 }
0x1219   :  { %v1409_v43 = vpop.permute.xlu1 %1408 }
0x121a   :  { %v1411_v46 = vmul.f32 %v1409_v43, %v1406_v42 }
0x121c   :  { %v1417_v56 = vadd.f32 %v1416_v45, %v1411_v46 }
0x121e   :  { %v1418_v57 = vsub.f32 %v1417_v56, %v1414_v18 }
0x1220   :  { %1420 = vrot.lane.b32.xlu1 %v1418_v57, %s1911_s24 }
0x1228   :  { %1536 = vrot.lane.b32.xlu1 %v1535_v48, %s1911_s24  ;;  %s1654_s24 = sshll.u32 %s2590_s13, 4  ;;  %s1655_s24 = int_to_ptr.hbm [resolvable:$true] %s1654_s24 }
0x1269   :  { %v1528_v17 = vpop.permute.xlu2 %1527 }
0x1292   :  { %v1421_v20 = vpop.permute.xlu1 %1420 }
0x1293   :  { %v1423_v21 = vmul.f32 %v2368_v15, %v1421_v20  ;;  %v1586_v15 = vld [vmem:[%s2587_s10 + $0x8] sm:$0xff] }
0x1295   :  { %v1425_v23 = vrot.slane %v1423_v21, 6 }
0x1297   :  { %v1427_v47 = vadd.f32 %v1425_v23, %v2405_v59  ;;  %v1587_v59 = vld [vmem:[%s2587_s10 + $0x10] sm:$0xff] }
0x1298   :  { %1613 = vmatpush.msra.mxu1 %v1587_v59 }
0x1299   :  { %1531 = vrot.lane.b32.xlu0 %v1427_v47, %s1913_s2  ;;  %v1428_v54 = vmul.f32 %v1427_v47, %v465_v22  ;;  %v1585_v22 = vld [vmem:[%s2587_s10] sm:$0xff]  ;;  %s1643_s10 = sshll.u32 %s2589_s12, 4  ;;  %s1652_s12 = sshll.u32 %s1916_s11, 4  ;;  %s1644_s10 = int_to_ptr.hbm [resolvable:$true] %s1643_s10  ;;  %s1653_s12 = int_to_ptr.vmem [resolvable:$true] %s1652_s12 }
0x129a   :  { %v1537_v52 = vpop.permute.xlu1 %1536  ;;  %1614 = vmatpush.msra.mxu1 %v1586_v15 }
0x129b   :  { %v1523_v8 = vmax.f32 %v1348_v62, %v1428_v54 }
0x129c   :  { %1615 = vmatpush.msra.mxu1 %v1585_v22 }
0x129d   :  { %v1539_v44 = vsel %vm73_vm0, %v1523_v8, %v1528_v17  ;;  %vm1620_vm0 = vcmask 123904  }
0x130b   :  { %v1532_v51 = vpop.permute.xlu0 %1531 }
0x130c   :  { %v1541_v19 = vsel %vm1540_vm7, %v1539_v44, %v1532_v51 }
0x130d   :  { %v1543_v24 = vsel %vm1542_vm8, %v1541_v19, %v1537_v52 }
0x130e   :  { %1580 = vmatmul.f32.vlgmr.msra.gmra.mxu0 %v1543_v24 }
0x138b   :  { %v1581_v35 = vpop.f32.mrf.mxu0 }
0x138c   :  { %v1582_v25 = vadd.f32 %v1720_v7, %v1581_v35 }
0x138e   :  { %v1584_v13 = vmax.f32 %v1582_v25, 0.0 }
0x1390   :  { %1710 = vmatmul.msk.f32.vlgmr.msra.gmra.mxu1 %vm1540_vm7, %v1584_v13 }
0x140d   :  { %v1617_v40 = vpop.f32.mrf.mxu1 }
0x140e   :  { %v1618_v41 = vadd.f32 %v1721_v39, %v1617_v40 }
0x1410   :  { %v1623_v18 = vand.u32 2147483647, %v1618_v41  ;;  %1621 = vst.msk [vmem:[#allocation2] sm:$0x3] %vm1620_vm0, %v1618_v41  ;;  %v1622_v57 = vmax.f32 %v1618_v41, 0.0 }
0x1411   :  { %1646 = dma.vmem_to_hbm [thread:$0]  %s1642_s23, 32, %s1644_s10, [#allocation3]  }
0x1412   :  { %v1624_v42 = vsub.f32 0.0, %v1623_v18 }
0x1414   :  { %v1625_v43 = vmul.f32 1.442695, %v1624_v42 }
0x1416   :  { %1850 = vpow2.f32 %v1625_v43 }
0x141c   :  { %v1851_v45 = vpop.eup %1850 }
0x141d   :  { %v1627_v46 = vadd.f32 1.0, %v1851_v45 }
0x141f   :  { %1852 = vlog2.f32 %v1627_v46 }
0x1425   :  { %v1853_v56 = vpop.eup %1852 }
0x1426   :  { %v1629_v48 = vmul.f32 0.6931472, %v1853_v56 }
0x1428   :  { %v1630_v58 = vadd.f32 %v1629_v48, %v1622_v57 }
0x142a   :  { %1632 = vrot.lane.b32.xlu2 %v1630_v58, %s1915_s9 }
0x1484   :  { %v1633_v61 = vpop.permute.xlu2 %1632 }
0x1485   :  { %1635 = vst.msk [vmem:[#allocation4] sm:$0x3] %vm1620_vm0, %v1633_v61 }
0x1486   :  { %1657 = dma.vmem_to_hbm [thread:$0]  %s1653_s12, 32, %s1655_s24, [#allocation5]  }
0x1487   :  { %1906 = dma.done.wait [#allocation3], 32  }
0x1488   :  { %1907 = vsyncadd [#allocation3], 4294967264 }
0x1489   :  { %1908 = dma.done.wait [#allocation5], 32  }
0x148a   :  { %1909 = vsyncadd [#allocation5], 4294967264 }
0x148b   :  { %1666 = vsyncpa [#allocation3], 1 }
0x148c   :  { %1667 = vsyncpa [#allocation5], 1 }

</bundles_post_ra>
